<compile_context>
chip_gen: v5e
topology: v5e:2x2
jax: 0.10.0
libtpu: 0.0.40
codegen_flags: <defaults>
</compile_context>

<pallas_src>
import jax
import jax.numpy as jnp
import numpy as np
from jax import lax
from jax.experimental import pallas as pl
from jax.experimental.pallas import tpu as pltpu


def _hydro_lstm_kernel(x2d_ref,           # (T*Bp, I)   time-major flattened input
                       w_ih0_ref,         # (I, 4H)
                       b0_ref,            # (1, 4H)     b_ih0 + b_hh0
                       w_hh0_ref,         # (H, 4H)
                       w_ih1_ref,         # (H, 4H)
                       b1_ref,            # (1, 4H)     b_ih1 + b_hh1
                       w_hh1_ref,         # (H, 4H)
                       w_fc_ref,          # (H, O)
                       b_fc_ref,          # (1, O)
                       out_ref,           # (Bp, O)
                       xproj_ref,         # VMEM scratch (T*Bp, 4H)
                       yproj_ref,         # VMEM scratch (T*Bp, 4H)
                       h1seq_ref):        # VMEM scratch (T*Bp, H)
    Bp, _ = out_ref.shape
    H = w_hh0_ref.shape[0]
    TBp = x2d_ref.shape[0]
    T = TBp // Bp

    # ---- hoisted: recurrent weights, gate lane mask, per-lane tanh scale ----
    w_hh0 = w_hh0_ref[...]                 # (H, 4H)
    w_hh1 = w_hh1_ref[...]                 # (H, 4H)

    # PyTorch gate order (i, f, g, o): lanes [2H, 3H) are the tanh 'g' gate.
    lane = lax.broadcasted_iota(jnp.int32, (Bp, 4 * H), 1)
    g_mask = (lane >= 2 * H) & (lane < 3 * H)
    # sigmoid(x) = 0.5*(tanh(x/2)+1)  ->  one tanh over the full gates vreg.
    scale = jnp.where(g_mask, jnp.float32(1.0), jnp.float32(0.5))

    def cell(gates, c_prev):
        th = jnp.tanh(gates * scale)                      # single EUP pass
        act = jnp.where(g_mask, th, 0.5 * th + 0.5)       # VPU select / blend
        i_g = act[:, 0 * H:1 * H]
        f_g = act[:, 1 * H:2 * H]
        g_g = act[:, 2 * H:3 * H]
        o_g = act[:, 3 * H:4 * H]
        c_new = f_g * c_prev + i_g * g_g
        h_new = o_g * jnp.tanh(c_new)
        return h_new, c_new

    zf = jnp.zeros((Bp, H), jnp.float32)

    # ---- layer 0: one-shot input projection, then the serial recurrence -----
    xproj_ref[...] = (jnp.dot(x2d_ref[...], w_ih0_ref[...],
                              preferred_element_type=jnp.float32)
                      + b0_ref[...])

    h1, c1 = zf, zf
    for t in range(T):                     # static unroll (T is small here)
        g0 = (xproj_ref[t * Bp:(t + 1) * Bp, :]
              + jnp.dot(h1, w_hh0, preferred_element_type=jnp.float32))
        h1, c1 = cell(g0, c1)
        h1seq_ref[t * Bp:(t + 1) * Bp, :] = h1   # off the critical path

    # ---- layer 1: one-shot input projection of the whole h1 sequence --------
    # (dropout between layers == identity, eval semantics)
    yproj_ref[...] = (jnp.dot(h1seq_ref[...], w_ih1_ref[...],
                              preferred_element_type=jnp.float32)
                      + b1_ref[...])

    h2, c2 = zf, zf
    for t in range(T):
        g1 = (yproj_ref[t * Bp:(t + 1) * Bp, :]
              + jnp.dot(h2, w_hh1, preferred_element_type=jnp.float32))
        h2, c2 = cell(g1, c2)

    # ---- final FC on the last hidden state of the top layer -----------------
    out_ref[...] = (jnp.dot(h2, w_fc_ref[...],
                            preferred_element_type=jnp.float32)
                    + b_fc_ref[...])


def hydro_lstm_forward(x, params, hidden_size, output_size, output_window):
    """x: (B, T, input_size) float32 -> (B, output_window, output_size)."""
    B, T, I = x.shape
    H = hidden_size
    O = output_size * output_window

    (w_ih0, w_hh0, b0, w_ih1, w_hh1, b1, w_fc, b_fc) = params

    # Pad the batch to the f32 sublane count so every per-step slice of the
    # projection scratch is sublane-aligned (pad rows are zero, sliced off
    # after the kernel; batch rows are independent in an LSTM).
    Bp = max(8, ((B + 7) // 8) * 8)
    if Bp != B:
        x = jnp.concatenate(
            [x, jnp.zeros((Bp - B, T, I), x.dtype)], axis=0)

    # Time-major flatten: row t*Bp + b is batch b at step t, so the one-shot
    # input projection is a plain 2-D matmul and step t owns a contiguous,
    # sublane-aligned row block.
    x2d = jnp.transpose(x, (1, 0, 2)).reshape(T * Bp, I)

    def full(a):
        n = a.ndim
        return pl.BlockSpec(a.shape, lambda i, n=n: (0,) * n)

    out_flat = pl.pallas_call(
        _hydro_lstm_kernel,
        out_shape=jax.ShapeDtypeStruct((Bp, O), jnp.float32),
        grid_spec=pltpu.PrefetchScalarGridSpec(
            num_scalar_prefetch=0,
            grid=(1,),                      # single invocation; loops in-kernel
            in_specs=[
                full(x2d),                  # (T*Bp, I)
                full(w_ih0),                # (I, 4H)
                full(b0),                   # (1, 4H)
                full(w_hh0),                # (H, 4H)
                full(w_ih1),                # (H, 4H)
                full(b1),                   # (1, 4H)
                full(w_hh1),                # (H, 4H)
                full(w_fc),                 # (H, O)
                full(b_fc),                 # (1, O)
            ],
            out_specs=pl.BlockSpec((Bp, O), lambda i: (0, 0)),
            scratch_shapes=[
                pltpu.VMEM((T * Bp, 4 * H), jnp.float32),   # xproj
                pltpu.VMEM((T * Bp, 4 * H), jnp.float32),   # yproj
                pltpu.VMEM((T * Bp, H), jnp.float32),       # h1 sequence
            ]),
        compiler_params=pltpu.CompilerParams(
            dimension_semantics=("arbitrary",)),
    )(x2d, w_ih0, b0, w_hh0, w_ih1, b1, w_hh1, w_fc, b_fc)

    return out_flat[:B].reshape(B, output_window, output_size)


def init_params(key, input_size, hidden_size, output_size, output_window):
    """Deterministic init mimicking PyTorch's U(-1/sqrt(H), 1/sqrt(H))."""
    H = hidden_size
    O = output_size * output_window
    k = 1.0 / np.sqrt(H)
    keys = jax.random.split(key, 10)
    u = lambda kk, shape: jax.random.uniform(kk, shape, jnp.float32, -k, k)

    # stored transposed: (in_features, out_features)
    w_ih0 = u(keys[0], (input_size, 4 * H))
    w_hh0 = u(keys[1], (H, 4 * H))
    b0 = (u(keys[2], (1, 4 * H)) + u(keys[3], (1, 4 * H)))  # b_ih + b_hh fused
    w_ih1 = u(keys[4], (H, 4 * H))
    w_hh1 = u(keys[5], (H, 4 * H))
    b1 = (u(keys[6], (1, 4 * H)) + u(keys[7], (1, 4 * H)))
    w_fc = u(keys[8], (H, O))
    b_fc = u(keys[9], (1, O))
    return (w_ih0, w_hh0, b0, w_ih1, w_hh1, b1, w_fc, b_fc)


def reference_forward(x, params, hidden_size, output_size, output_window):
    """Pure-JAX reference (lax.scan) matching PyTorch nn.LSTM eval semantics."""
    B, T, I = x.shape
    H = hidden_size
    (w_ih0, w_hh0, b0, w_ih1, w_hh1, b1, w_fc, b_fc) = params

    def cell(x_in, h, c, w_ih, w_hh, b):
        g = x_in @ w_ih + h @ w_hh + b
        i = jax.nn.sigmoid(g[:, 0 * H:1 * H])
        f = jax.nn.sigmoid(g[:, 1 * H:2 * H])
        gg = jnp.tanh(g[:, 2 * H:3 * H])
        o = jax.nn.sigmoid(g[:, 3 * H:4 * H])
        c_new = f * c + i * gg
        return o * jnp.tanh(c_new), c_new

    def step(carry, x_t):
        h1, c1, h2, c2 = carry
        h1, c1 = cell(x_t, h1, c1, w_ih0, w_hh0, b0)
        h2, c2 = cell(h1, h2, c2, w_ih1, w_hh1, b1)
        return (h1, c1, h2, c2), None

    z = jnp.zeros((B, H), jnp.float32)
    (h1, c1, h2, c2), _ = lax.scan(step, (z, z, z, z),
                                   jnp.transpose(x, (1, 0, 2)))
    out = h2 @ w_fc + b_fc
    return out.reshape(B, output_window, output_size)


if __name__ == "__main__":
    # small shapes consistent with the module's forward
    B, T = 2, 8
    input_size = 4
    hidden_size = 32
    output_size = 1
    output_window = 6

    key = jax.random.PRNGKey(0)
    k_x, k_p = jax.random.split(key)
    x = jax.random.normal(k_x, (B, T, input_size), jnp.float32)
    params = init_params(k_p, input_size, hidden_size, output_size,
                         output_window)

    out = hydro_lstm_forward(x, params, hidden_size, output_size,
                             output_window)
    out = jax.block_until_ready(out)

    ref = reference_forward(x, params, hidden_size, output_size,
                            output_window)
    np.testing.assert_allclose(np.asarray(out), np.asarray(ref),
                               rtol=1e-5, atol=1e-5)
    assert out.shape == (B, output_window, output_size)
    print("KERNEL_OK")
</pallas_src>

<mosaic_0001>
module attributes {stable_mosaic.version = 11 : i64} {
  func.func @_hydro_lstm_kernel(%arg0: i32, %arg1: memref<64x4xf32, #tpu.memory_space<vmem>>, %arg2: memref<4x128xf32, #tpu.memory_space<vmem>>, %arg3: memref<1x128xf32, #tpu.memory_space<vmem>>, %arg4: memref<32x128xf32, #tpu.memory_space<vmem>>, %arg5: memref<32x128xf32, #tpu.memory_space<vmem>>, %arg6: memref<1x128xf32, #tpu.memory_space<vmem>>, %arg7: memref<32x128xf32, #tpu.memory_space<vmem>>, %arg8: memref<32x6xf32, #tpu.memory_space<vmem>>, %arg9: memref<1x6xf32, #tpu.memory_space<vmem>>, %arg10: memref<8x6xf32, #tpu.memory_space<vmem>>, %arg11: memref<64x128xf32, #tpu.memory_space<vmem>>, %arg12: memref<64x128xf32, #tpu.memory_space<vmem>>, %arg13: memref<64x32xf32, #tpu.memory_space<vmem>>) attributes {dimension_semantics = [#tpu.dimension_semantics<arbitrary>], iteration_bounds = array<i64: 1>, scalar_prefetch = 0 : i64, scratch_operands = 3 : i64, tpu.core_type = #tpu.core_type<tc>, window_params = [{pipeline_mode = #tpu.pipeline_mode<synchronous>, transform_indices = @transform_0, window_bounds = array<i64: 64, 4>}, {pipeline_mode = #tpu.pipeline_mode<synchronous>, transform_indices = @transform_1, window_bounds = array<i64: 4, 128>}, {pipeline_mode = #tpu.pipeline_mode<synchronous>, transform_indices = @transform_2, window_bounds = array<i64: 1, 128>}, {pipeline_mode = #tpu.pipeline_mode<synchronous>, transform_indices = @transform_3, window_bounds = array<i64: 32, 128>}, {pipeline_mode = #tpu.pipeline_mode<synchronous>, transform_indices = @transform_4, window_bounds = array<i64: 32, 128>}, {pipeline_mode = #tpu.pipeline_mode<synchronous>, transform_indices = @transform_5, window_bounds = array<i64: 1, 128>}, {pipeline_mode = #tpu.pipeline_mode<synchronous>, transform_indices = @transform_6, window_bounds = array<i64: 32, 128>}, {pipeline_mode = #tpu.pipeline_mode<synchronous>, transform_indices = @transform_7, window_bounds = array<i64: 32, 6>}, {pipeline_mode = #tpu.pipeline_mode<synchronous>, transform_indices = @transform_8, window_bounds = array<i64: 1, 6>}, {pipeline_mode = #tpu.pipeline_mode<synchronous>, transform_indices = @transform_9, window_bounds = array<i64: 8, 6>}]} {
    %c0 = arith.constant 0 : index
    %c0_0 = arith.constant 0 : index
    %0 = vector.load %arg4[%c0, %c0_0] : memref<32x128xf32, #tpu.memory_space<vmem>>, vector<32x128xf32>
    %c0_1 = arith.constant 0 : index
    %c0_2 = arith.constant 0 : index
    %1 = vector.load %arg7[%c0_1, %c0_2] : memref<32x128xf32, #tpu.memory_space<vmem>>, vector<32x128xf32>
    %2 = tpu.iota {dimensions = array<i32: 1>} : vector<8x128xi32>
    %c64_i32 = arith.constant 64 : i32
    %3 = vector.broadcast %c64_i32 : i32 to vector<8x128xi32>
    %4 = arith.cmpi sge, %2, %3 : vector<8x128xi32>
    %c96_i32 = arith.constant 96 : i32
    %5 = vector.broadcast %c96_i32 : i32 to vector<8x128xi32>
    %6 = arith.cmpi slt, %2, %5 : vector<8x128xi32>
    %7 = arith.andi %4, %6 : vector<8x128xi1>
    %cst = arith.constant 1.000000e+00 : f32
    %cst_3 = arith.constant 5.000000e-01 : f32
    %8 = vector.broadcast %cst : f32 to vector<8x128xf32>
    %9 = vector.broadcast %cst_3 : f32 to vector<8x128xf32>
    %10 = arith.select %7, %8, %9 : vector<8x128xi1>, vector<8x128xf32>
    %cst_4 = arith.constant 0.000000e+00 : f32
    %11 = vector.broadcast %cst_4 : f32 to vector<8x32xf32>
    %c0_5 = arith.constant 0 : index
    %c0_6 = arith.constant 0 : index
    %12 = vector.load %arg1[%c0_5, %c0_6] : memref<64x4xf32, #tpu.memory_space<vmem>>, vector<64x4xf32>
    %c0_7 = arith.constant 0 : index
    %c0_8 = arith.constant 0 : index
    %13 = vector.load %arg2[%c0_7, %c0_8] : memref<4x128xf32, #tpu.memory_space<vmem>>, vector<4x128xf32>
    %cst_9 = arith.constant dense<0.000000e+00> : vector<64x128xf32>
    %14 = tpu.matmul %12, %13, %cst_9 {dimension_numbers = #tpu.dot_dimension_numbers<[1], [0], [0], [1], [0, 0, 1, 1], [], []>} : vector<64x4xf32>, vector<4x128xf32>, vector<64x128xf32> -> vector<64x128xf32>
    %c0_10 = arith.constant 0 : index
    %c0_11 = arith.constant 0 : index
    %15 = vector.load %arg3[%c0_10, %c0_11] : memref<1x128xf32, #tpu.memory_space<vmem>>, vector<1x128xf32>
    %16 = vector.broadcast %15 : vector<1x128xf32> to vector<64x128xf32>
    %17 = arith.addf %14, %16 : vector<64x128xf32>
    %c0_12 = arith.constant 0 : index
    %c0_13 = arith.constant 0 : index
    %18 = vector.load %arg11[%c0_12, %c0_13] : memref<64x128xf32, #tpu.memory_space<vmem>>, vector<64x128xf32>
    tpu.vector_store %arg11[%c0_12, %c0_13], %17 {strides = array<i32>} : memref<64x128xf32, #tpu.memory_space<vmem>>, vector<64x128xf32>,
    %c0_14 = arith.constant 0 : index
    %c0_15 = arith.constant 0 : index
    %19 = vector.load %arg11[%c0_14, %c0_15] : memref<64x128xf32, #tpu.memory_space<vmem>>, vector<8x128xf32>
    %cst_16 = arith.constant dense<0.000000e+00> : vector<8x128xf32>
    %20 = tpu.matmul %11, %0, %cst_16 {dimension_numbers = #tpu.dot_dimension_numbers<[1], [0], [0], [1], [0, 0, 1, 1], [], []>} : vector<8x32xf32>, vector<32x128xf32>, vector<8x128xf32> -> vector<8x128xf32>
    %21 = arith.addf %19, %20 : vector<8x128xf32>
    %22 = arith.mulf %21, %10 : vector<8x128xf32>
    %23 = math.tanh %22 : vector<8x128xf32>
    %cst_17 = arith.constant 5.000000e-01 : f32
    %24 = vector.broadcast %cst_17 : f32 to vector<8x128xf32>
    %25 = arith.mulf %24, %23 : vector<8x128xf32>
    %cst_18 = arith.constant 5.000000e-01 : f32
    %26 = vector.broadcast %cst_18 : f32 to vector<8x128xf32>
    %27 = arith.addf %25, %26 : vector<8x128xf32>
    %28 = arith.select %7, %23, %27 : vector<8x128xi1>, vector<8x128xf32>
    %29 = vector.extract_strided_slice %28 {offsets = [0, 0], sizes = [8, 32], strides = [1, 1]} : vector<8x128xf32> to vector<8x32xf32>
    %30 = vector.extract_strided_slice %28 {offsets = [0, 32], sizes = [8, 32], strides = [1, 1]} : vector<8x128xf32> to vector<8x32xf32>
    %31 = vector.extract_strided_slice %28 {offsets = [0, 64], sizes = [8, 32], strides = [1, 1]} : vector<8x128xf32> to vector<8x32xf32>
    %32 = vector.extract_strided_slice %28 {offsets = [0, 96], sizes = [8, 32], strides = [1, 1]} : vector<8x128xf32> to vector<8x32xf32>
    %33 = arith.mulf %30, %11 : vector<8x32xf32>
    %34 = arith.mulf %29, %31 : vector<8x32xf32>
    %35 = arith.addf %33, %34 : vector<8x32xf32>
    %36 = math.tanh %35 : vector<8x32xf32>
    %37 = arith.mulf %32, %36 : vector<8x32xf32>
    %c0_19 = arith.constant 0 : index
    %c0_20 = arith.constant 0 : index
    %38 = vector.load %arg13[%c0_19, %c0_20] : memref<64x32xf32, #tpu.memory_space<vmem>>, vector<8x32xf32>
    tpu.vector_store %arg13[%c0_19, %c0_20], %37 {strides = array<i32>} : memref<64x32xf32, #tpu.memory_space<vmem>>, vector<8x32xf32>,
    %c8 = arith.constant 8 : index
    %c0_21 = arith.constant 0 : index
    %39 = vector.load %arg11[%c8, %c0_21] : memref<64x128xf32, #tpu.memory_space<vmem>>, vector<8x128xf32>
    %cst_22 = arith.constant dense<0.000000e+00> : vector<8x128xf32>
    %40 = tpu.matmul %37, %0, %cst_22 {dimension_numbers = #tpu.dot_dimension_numbers<[1], [0], [0], [1], [0, 0, 1, 1], [], []>} : vector<8x32xf32>, vector<32x128xf32>, vector<8x128xf32> -> vector<8x128xf32>
    %41 = arith.addf %39, %40 : vector<8x128xf32>
    %42 = arith.mulf %41, %10 : vector<8x128xf32>
    %43 = math.tanh %42 : vector<8x128xf32>
    %cst_23 = arith.constant 5.000000e-01 : f32
    %44 = vector.broadcast %cst_23 : f32 to vector<8x128xf32>
    %45 = arith.mulf %44, %43 : vector<8x128xf32>
    %cst_24 = arith.constant 5.000000e-01 : f32
    %46 = vector.broadcast %cst_24 : f32 to vector<8x128xf32>
    %47 = arith.addf %45, %46 : vector<8x128xf32>
    %48 = arith.select %7, %43, %47 : vector<8x128xi1>, vector<8x128xf32>
    %49 = vector.extract_strided_slice %48 {offsets = [0, 0], sizes = [8, 32], strides = [1, 1]} : vector<8x128xf32> to vector<8x32xf32>
    %50 = vector.extract_strided_slice %48 {offsets = [0, 32], sizes = [8, 32], strides = [1, 1]} : vector<8x128xf32> to vector<8x32xf32>
    %51 = vector.extract_strided_slice %48 {offsets = [0, 64], sizes = [8, 32], strides = [1, 1]} : vector<8x128xf32> to vector<8x32xf32>
    %52 = vector.extract_strided_slice %48 {offsets = [0, 96], sizes = [8, 32], strides = [1, 1]} : vector<8x128xf32> to vector<8x32xf32>
    %53 = arith.mulf %50, %35 : vector<8x32xf32>
    %54 = arith.mulf %49, %51 : vector<8x32xf32>
    %55 = arith.addf %53, %54 : vector<8x32xf32>
    %56 = math.tanh %55 : vector<8x32xf32>
    %57 = arith.mulf %52, %56 : vector<8x32xf32>
    %c8_25 = arith.constant 8 : index
    %c0_26 = arith.constant 0 : index
    %58 = vector.load %arg13[%c8_25, %c0_26] : memref<64x32xf32, #tpu.memory_space<vmem>>, vector<8x32xf32>
    tpu.vector_store %arg13[%c8_25, %c0_26], %57 {strides = array<i32>} : memref<64x32xf32, #tpu.memory_space<vmem>>, vector<8x32xf32>,
    %c16 = arith.constant 16 : index
    %c0_27 = arith.constant 0 : index
    %59 = vector.load %arg11[%c16, %c0_27] : memref<64x128xf32, #tpu.memory_space<vmem>>, vector<8x128xf32>
    %cst_28 = arith.constant dense<0.000000e+00> : vector<8x128xf32>
    %60 = tpu.matmul %57, %0, %cst_28 {dimension_numbers = #tpu.dot_dimension_numbers<[1], [0], [0], [1], [0, 0, 1, 1], [], []>} : vector<8x32xf32>, vector<32x128xf32>, vector<8x128xf32> -> vector<8x128xf32>
    %61 = arith.addf %59, %60 : vector<8x128xf32>
    %62 = arith.mulf %61, %10 : vector<8x128xf32>
    %63 = math.tanh %62 : vector<8x128xf32>
    %cst_29 = arith.constant 5.000000e-01 : f32
    %64 = vector.broadcast %cst_29 : f32 to vector<8x128xf32>
    %65 = arith.mulf %64, %63 : vector<8x128xf32>
    %cst_30 = arith.constant 5.000000e-01 : f32
    %66 = vector.broadcast %cst_30 : f32 to vector<8x128xf32>
    %67 = arith.addf %65, %66 : vector<8x128xf32>
    %68 = arith.select %7, %63, %67 : vector<8x128xi1>, vector<8x128xf32>
    %69 = vector.extract_strided_slice %68 {offsets = [0, 0], sizes = [8, 32], strides = [1, 1]} : vector<8x128xf32> to vector<8x32xf32>
    %70 = vector.extract_strided_slice %68 {offsets = [0, 32], sizes = [8, 32], strides = [1, 1]} : vector<8x128xf32> to vector<8x32xf32>
    %71 = vector.extract_strided_slice %68 {offsets = [0, 64], sizes = [8, 32], strides = [1, 1]} : vector<8x128xf32> to vector<8x32xf32>
    %72 = vector.extract_strided_slice %68 {offsets = [0, 96], sizes = [8, 32], strides = [1, 1]} : vector<8x128xf32> to vector<8x32xf32>
    %73 = arith.mulf %70, %55 : vector<8x32xf32>
    %74 = arith.mulf %69, %71 : vector<8x32xf32>
    %75 = arith.addf %73, %74 : vector<8x32xf32>
    %76 = math.tanh %75 : vector<8x32xf32>
    %77 = arith.mulf %72, %76 : vector<8x32xf32>
    %c16_31 = arith.constant 16 : index
    %c0_32 = arith.constant 0 : index
    %78 = vector.load %arg13[%c16_31, %c0_32] : memref<64x32xf32, #tpu.memory_space<vmem>>, vector<8x32xf32>
    tpu.vector_store %arg13[%c16_31, %c0_32], %77 {strides = array<i32>} : memref<64x32xf32, #tpu.memory_space<vmem>>, vector<8x32xf32>,
    %c24 = arith.constant 24 : index
    %c0_33 = arith.constant 0 : index
    %79 = vector.load %arg11[%c24, %c0_33] : memref<64x128xf32, #tpu.memory_space<vmem>>, vector<8x128xf32>
    %cst_34 = arith.constant dense<0.000000e+00> : vector<8x128xf32>
    %80 = tpu.matmul %77, %0, %cst_34 {dimension_numbers = #tpu.dot_dimension_numbers<[1], [0], [0], [1], [0, 0, 1, 1], [], []>} : vector<8x32xf32>, vector<32x128xf32>, vector<8x128xf32> -> vector<8x128xf32>
    %81 = arith.addf %79, %80 : vector<8x128xf32>
    %82 = arith.mulf %81, %10 : vector<8x128xf32>
    %83 = math.tanh %82 : vector<8x128xf32>
    %cst_35 = arith.constant 5.000000e-01 : f32
    %84 = vector.broadcast %cst_35 : f32 to vector<8x128xf32>
    %85 = arith.mulf %84, %83 : vector<8x128xf32>
    %cst_36 = arith.constant 5.000000e-01 : f32
    %86 = vector.broadcast %cst_36 : f32 to vector<8x128xf32>
    %87 = arith.addf %85, %86 : vector<8x128xf32>
    %88 = arith.select %7, %83, %87 : vector<8x128xi1>, vector<8x128xf32>
    %89 = vector.extract_strided_slice %88 {offsets = [0, 0], sizes = [8, 32], strides = [1, 1]} : vector<8x128xf32> to vector<8x32xf32>
    %90 = vector.extract_strided_slice %88 {offsets = [0, 32], sizes = [8, 32], strides = [1, 1]} : vector<8x128xf32> to vector<8x32xf32>
    %91 = vector.extract_strided_slice %88 {offsets = [0, 64], sizes = [8, 32], strides = [1, 1]} : vector<8x128xf32> to vector<8x32xf32>
    %92 = vector.extract_strided_slice %88 {offsets = [0, 96], sizes = [8, 32], strides = [1, 1]} : vector<8x128xf32> to vector<8x32xf32>
    %93 = arith.mulf %90, %75 : vector<8x32xf32>
    %94 = arith.mulf %89, %91 : vector<8x32xf32>
    %95 = arith.addf %93, %94 : vector<8x32xf32>
    %96 = math.tanh %95 : vector<8x32xf32>
    %97 = arith.mulf %92, %96 : vector<8x32xf32>
    %c24_37 = arith.constant 24 : index
    %c0_38 = arith.constant 0 : index
    %98 = vector.load %arg13[%c24_37, %c0_38] : memref<64x32xf32, #tpu.memory_space<vmem>>, vector<8x32xf32>
    tpu.vector_store %arg13[%c24_37, %c0_38], %97 {strides = array<i32>} : memref<64x32xf32, #tpu.memory_space<vmem>>, vector<8x32xf32>,
    %c32 = arith.constant 32 : index
    %c0_39 = arith.constant 0 : index
    %99 = vector.load %arg11[%c32, %c0_39] : memref<64x128xf32, #tpu.memory_space<vmem>>, vector<8x128xf32>
    %cst_40 = arith.constant dense<0.000000e+00> : vector<8x128xf32>
    %100 = tpu.matmul %97, %0, %cst_40 {dimension_numbers = #tpu.dot_dimension_numbers<[1], [0], [0], [1], [0, 0, 1, 1], [], []>} : vector<8x32xf32>, vector<32x128xf32>, vector<8x128xf32> -> vector<8x128xf32>
    %101 = arith.addf %99, %100 : vector<8x128xf32>
    %102 = arith.mulf %101, %10 : vector<8x128xf32>
    %103 = math.tanh %102 : vector<8x128xf32>
    %cst_41 = arith.constant 5.000000e-01 : f32
    %104 = vector.broadcast %cst_41 : f32 to vector<8x128xf32>
    %105 = arith.mulf %104, %103 : vector<8x128xf32>
    %cst_42 = arith.constant 5.000000e-01 : f32
    %106 = vector.broadcast %cst_42 : f32 to vector<8x128xf32>
    %107 = arith.addf %105, %106 : vector<8x128xf32>
    %108 = arith.select %7, %103, %107 : vector<8x128xi1>, vector<8x128xf32>
    %109 = vector.extract_strided_slice %108 {offsets = [0, 0], sizes = [8, 32], strides = [1, 1]} : vector<8x128xf32> to vector<8x32xf32>
    %110 = vector.extract_strided_slice %108 {offsets = [0, 32], sizes = [8, 32], strides = [1, 1]} : vector<8x128xf32> to vector<8x32xf32>
    %111 = vector.extract_strided_slice %108 {offsets = [0, 64], sizes = [8, 32], strides = [1, 1]} : vector<8x128xf32> to vector<8x32xf32>
    %112 = vector.extract_strided_slice %108 {offsets = [0, 96], sizes = [8, 32], strides = [1, 1]} : vector<8x128xf32> to vector<8x32xf32>
    %113 = arith.mulf %110, %95 : vector<8x32xf32>
    %114 = arith.mulf %109, %111 : vector<8x32xf32>
    %115 = arith.addf %113, %114 : vector<8x32xf32>
    %116 = math.tanh %115 : vector<8x32xf32>
    %117 = arith.mulf %112, %116 : vector<8x32xf32>
    %c32_43 = arith.constant 32 : index
    %c0_44 = arith.constant 0 : index
    %118 = vector.load %arg13[%c32_43, %c0_44] : memref<64x32xf32, #tpu.memory_space<vmem>>, vector<8x32xf32>
    tpu.vector_store %arg13[%c32_43, %c0_44], %117 {strides = array<i32>} : memref<64x32xf32, #tpu.memory_space<vmem>>, vector<8x32xf32>,
    %c40 = arith.constant 40 : index
    %c0_45 = arith.constant 0 : index
    %119 = vector.load %arg11[%c40, %c0_45] : memref<64x128xf32, #tpu.memory_space<vmem>>, vector<8x128xf32>
    %cst_46 = arith.constant dense<0.000000e+00> : vector<8x128xf32>
    %120 = tpu.matmul %117, %0, %cst_46 {dimension_numbers = #tpu.dot_dimension_numbers<[1], [0], [0], [1], [0, 0, 1, 1], [], []>} : vector<8x32xf32>, vector<32x128xf32>, vector<8x128xf32> -> vector<8x128xf32>
    %121 = arith.addf %119, %120 : vector<8x128xf32>
    %122 = arith.mulf %121, %10 : vector<8x128xf32>
    %123 = math.tanh %122 : vector<8x128xf32>
    %cst_47 = arith.constant 5.000000e-01 : f32
    %124 = vector.broadcast %cst_47 : f32 to vector<8x128xf32>
    %125 = arith.mulf %124, %123 : vector<8x128xf32>
    %cst_48 = arith.constant 5.000000e-01 : f32
    %126 = vector.broadcast %cst_48 : f32 to vector<8x128xf32>
    %127 = arith.addf %125, %126 : vector<8x128xf32>
    %128 = arith.select %7, %123, %127 : vector<8x128xi1>, vector<8x128xf32>
    %129 = vector.extract_strided_slice %128 {offsets = [0, 0], sizes = [8, 32], strides = [1, 1]} : vector<8x128xf32> to vector<8x32xf32>
    %130 = vector.extract_strided_slice %128 {offsets = [0, 32], sizes = [8, 32], strides = [1, 1]} : vector<8x128xf32> to vector<8x32xf32>
    %131 = vector.extract_strided_slice %128 {offsets = [0, 64], sizes = [8, 32], strides = [1, 1]} : vector<8x128xf32> to vector<8x32xf32>
    %132 = vector.extract_strided_slice %128 {offsets = [0, 96], sizes = [8, 32], strides = [1, 1]} : vector<8x128xf32> to vector<8x32xf32>
    %133 = arith.mulf %130, %115 : vector<8x32xf32>
    %134 = arith.mulf %129, %131 : vector<8x32xf32>
    %135 = arith.addf %133, %134 : vector<8x32xf32>
    %136 = math.tanh %135 : vector<8x32xf32>
    %137 = arith.mulf %132, %136 : vector<8x32xf32>
    %c40_49 = arith.constant 40 : index
    %c0_50 = arith.constant 0 : index
    %138 = vector.load %arg13[%c40_49, %c0_50] : memref<64x32xf32, #tpu.memory_space<vmem>>, vector<8x32xf32>
    tpu.vector_store %arg13[%c40_49, %c0_50], %137 {strides = array<i32>} : memref<64x32xf32, #tpu.memory_space<vmem>>, vector<8x32xf32>,
    %c48 = arith.constant 48 : index
    %c0_51 = arith.constant 0 : index
    %139 = vector.load %arg11[%c48, %c0_51] : memref<64x128xf32, #tpu.memory_space<vmem>>, vector<8x128xf32>
    %cst_52 = arith.constant dense<0.000000e+00> : vector<8x128xf32>
    %140 = tpu.matmul %137, %0, %cst_52 {dimension_numbers = #tpu.dot_dimension_numbers<[1], [0], [0], [1], [0, 0, 1, 1], [], []>} : vector<8x32xf32>, vector<32x128xf32>, vector<8x128xf32> -> vector<8x128xf32>
    %141 = arith.addf %139, %140 : vector<8x128xf32>
    %142 = arith.mulf %141, %10 : vector<8x128xf32>
    %143 = math.tanh %142 : vector<8x128xf32>
    %cst_53 = arith.constant 5.000000e-01 : f32
    %144 = vector.broadcast %cst_53 : f32 to vector<8x128xf32>
    %145 = arith.mulf %144, %143 : vector<8x128xf32>
    %cst_54 = arith.constant 5.000000e-01 : f32
    %146 = vector.broadcast %cst_54 : f32 to vector<8x128xf32>
    %147 = arith.addf %145, %146 : vector<8x128xf32>
    %148 = arith.select %7, %143, %147 : vector<8x128xi1>, vector<8x128xf32>
    %149 = vector.extract_strided_slice %148 {offsets = [0, 0], sizes = [8, 32], strides = [1, 1]} : vector<8x128xf32> to vector<8x32xf32>
    %150 = vector.extract_strided_slice %148 {offsets = [0, 32], sizes = [8, 32], strides = [1, 1]} : vector<8x128xf32> to vector<8x32xf32>
    %151 = vector.extract_strided_slice %148 {offsets = [0, 64], sizes = [8, 32], strides = [1, 1]} : vector<8x128xf32> to vector<8x32xf32>
    %152 = vector.extract_strided_slice %148 {offsets = [0, 96], sizes = [8, 32], strides = [1, 1]} : vector<8x128xf32> to vector<8x32xf32>
    %153 = arith.mulf %150, %135 : vector<8x32xf32>
    %154 = arith.mulf %149, %151 : vector<8x32xf32>
    %155 = arith.addf %153, %154 : vector<8x32xf32>
    %156 = math.tanh %155 : vector<8x32xf32>
    %157 = arith.mulf %152, %156 : vector<8x32xf32>
    %c48_55 = arith.constant 48 : index
    %c0_56 = arith.constant 0 : index
    %158 = vector.load %arg13[%c48_55, %c0_56] : memref<64x32xf32, #tpu.memory_space<vmem>>, vector<8x32xf32>
    tpu.vector_store %arg13[%c48_55, %c0_56], %157 {strides = array<i32>} : memref<64x32xf32, #tpu.memory_space<vmem>>, vector<8x32xf32>,
    %c56 = arith.constant 56 : index
    %c0_57 = arith.constant 0 : index
    %159 = vector.load %arg11[%c56, %c0_57] : memref<64x128xf32, #tpu.memory_space<vmem>>, vector<8x128xf32>
    %cst_58 = arith.constant dense<0.000000e+00> : vector<8x128xf32>
    %160 = tpu.matmul %157, %0, %cst_58 {dimension_numbers = #tpu.dot_dimension_numbers<[1], [0], [0], [1], [0, 0, 1, 1], [], []>} : vector<8x32xf32>, vector<32x128xf32>, vector<8x128xf32> -> vector<8x128xf32>
    %161 = arith.addf %159, %160 : vector<8x128xf32>
    %162 = arith.mulf %161, %10 : vector<8x128xf32>
    %163 = math.tanh %162 : vector<8x128xf32>
    %cst_59 = arith.constant 5.000000e-01 : f32
    %164 = vector.broadcast %cst_59 : f32 to vector<8x128xf32>
    %165 = arith.mulf %164, %163 : vector<8x128xf32>
    %cst_60 = arith.constant 5.000000e-01 : f32
    %166 = vector.broadcast %cst_60 : f32 to vector<8x128xf32>
    %167 = arith.addf %165, %166 : vector<8x128xf32>
    %168 = arith.select %7, %163, %167 : vector<8x128xi1>, vector<8x128xf32>
    %169 = vector.extract_strided_slice %168 {offsets = [0, 0], sizes = [8, 32], strides = [1, 1]} : vector<8x128xf32> to vector<8x32xf32>
    %170 = vector.extract_strided_slice %168 {offsets = [0, 32], sizes = [8, 32], strides = [1, 1]} : vector<8x128xf32> to vector<8x32xf32>
    %171 = vector.extract_strided_slice %168 {offsets = [0, 64], sizes = [8, 32], strides = [1, 1]} : vector<8x128xf32> to vector<8x32xf32>
    %172 = vector.extract_strided_slice %168 {offsets = [0, 96], sizes = [8, 32], strides = [1, 1]} : vector<8x128xf32> to vector<8x32xf32>
    %173 = arith.mulf %170, %155 : vector<8x32xf32>
    %174 = arith.mulf %169, %171 : vector<8x32xf32>
    %175 = arith.addf %173, %174 : vector<8x32xf32>
    %176 = math.tanh %175 : vector<8x32xf32>
    %177 = arith.mulf %172, %176 : vector<8x32xf32>
    %c56_61 = arith.constant 56 : index
    %c0_62 = arith.constant 0 : index
    %178 = vector.load %arg13[%c56_61, %c0_62] : memref<64x32xf32, #tpu.memory_space<vmem>>, vector<8x32xf32>
    tpu.vector_store %arg13[%c56_61, %c0_62], %177 {strides = array<i32>} : memref<64x32xf32, #tpu.memory_space<vmem>>, vector<8x32xf32>,
    %c0_63 = arith.constant 0 : index
    %c0_64 = arith.constant 0 : index
    %179 = vector.load %arg13[%c0_63, %c0_64] : memref<64x32xf32, #tpu.memory_space<vmem>>, vector<64x32xf32>
    %c0_65 = arith.constant 0 : index
    %c0_66 = arith.constant 0 : index
    %180 = vector.load %arg5[%c0_65, %c0_66] : memref<32x128xf32, #tpu.memory_space<vmem>>, vector<32x128xf32>
    %cst_67 = arith.constant dense<0.000000e+00> : vector<64x128xf32>
    %181 = tpu.matmul %179, %180, %cst_67 {dimension_numbers = #tpu.dot_dimension_numbers<[1], [0], [0], [1], [0, 0, 1, 1], [], []>} : vector<64x32xf32>, vector<32x128xf32>, vector<64x128xf32> -> vector<64x128xf32>
    %c0_68 = arith.constant 0 : index
    %c0_69 = arith.constant 0 : index
    %182 = vector.load %arg6[%c0_68, %c0_69] : memref<1x128xf32, #tpu.memory_space<vmem>>, vector<1x128xf32>
    %183 = vector.broadcast %182 : vector<1x128xf32> to vector<64x128xf32>
    %184 = arith.addf %181, %183 : vector<64x128xf32>
    %c0_70 = arith.constant 0 : index
    %c0_71 = arith.constant 0 : index
    %185 = vector.load %arg12[%c0_70, %c0_71] : memref<64x128xf32, #tpu.memory_space<vmem>>, vector<64x128xf32>
    tpu.vector_store %arg12[%c0_70, %c0_71], %184 {strides = array<i32>} : memref<64x128xf32, #tpu.memory_space<vmem>>, vector<64x128xf32>,
    %c0_72 = arith.constant 0 : index
    %c0_73 = arith.constant 0 : index
    %186 = vector.load %arg12[%c0_72, %c0_73] : memref<64x128xf32, #tpu.memory_space<vmem>>, vector<8x128xf32>
    %cst_74 = arith.constant dense<0.000000e+00> : vector<8x128xf32>
    %187 = tpu.matmul %11, %1, %cst_74 {dimension_numbers = #tpu.dot_dimension_numbers<[1], [0], [0], [1], [0, 0, 1, 1], [], []>} : vector<8x32xf32>, vector<32x128xf32>, vector<8x128xf32> -> vector<8x128xf32>
    %188 = arith.addf %186, %187 : vector<8x128xf32>
    %189 = arith.mulf %188, %10 : vector<8x128xf32>
    %190 = math.tanh %189 : vector<8x128xf32>
    %cst_75 = arith.constant 5.000000e-01 : f32
    %191 = vector.broadcast %cst_75 : f32 to vector<8x128xf32>
    %192 = arith.mulf %191, %190 : vector<8x128xf32>
    %cst_76 = arith.constant 5.000000e-01 : f32
    %193 = vector.broadcast %cst_76 : f32 to vector<8x128xf32>
    %194 = arith.addf %192, %193 : vector<8x128xf32>
    %195 = arith.select %7, %190, %194 : vector<8x128xi1>, vector<8x128xf32>
    %196 = vector.extract_strided_slice %195 {offsets = [0, 0], sizes = [8, 32], strides = [1, 1]} : vector<8x128xf32> to vector<8x32xf32>
    %197 = vector.extract_strided_slice %195 {offsets = [0, 32], sizes = [8, 32], strides = [1, 1]} : vector<8x128xf32> to vector<8x32xf32>
    %198 = vector.extract_strided_slice %195 {offsets = [0, 64], sizes = [8, 32], strides = [1, 1]} : vector<8x128xf32> to vector<8x32xf32>
    %199 = vector.extract_strided_slice %195 {offsets = [0, 96], sizes = [8, 32], strides = [1, 1]} : vector<8x128xf32> to vector<8x32xf32>
    %200 = arith.mulf %197, %11 : vector<8x32xf32>
    %201 = arith.mulf %196, %198 : vector<8x32xf32>
    %202 = arith.addf %200, %201 : vector<8x32xf32>
    %203 = math.tanh %202 : vector<8x32xf32>
    %204 = arith.mulf %199, %203 : vector<8x32xf32>
    %c8_77 = arith.constant 8 : index
    %c0_78 = arith.constant 0 : index
    %205 = vector.load %arg12[%c8_77, %c0_78] : memref<64x128xf32, #tpu.memory_space<vmem>>, vector<8x128xf32>
    %cst_79 = arith.constant dense<0.000000e+00> : vector<8x128xf32>
    %206 = tpu.matmul %204, %1, %cst_79 {dimension_numbers = #tpu.dot_dimension_numbers<[1], [0], [0], [1], [0, 0, 1, 1], [], []>} : vector<8x32xf32>, vector<32x128xf32>, vector<8x128xf32> -> vector<8x128xf32>
    %207 = arith.addf %205, %206 : vector<8x128xf32>
    %208 = arith.mulf %207, %10 : vector<8x128xf32>
    %209 = math.tanh %208 : vector<8x128xf32>
    %cst_80 = arith.constant 5.000000e-01 : f32
    %210 = vector.broadcast %cst_80 : f32 to vector<8x128xf32>
    %211 = arith.mulf %210, %209 : vector<8x128xf32>
    %cst_81 = arith.constant 5.000000e-01 : f32
    %212 = vector.broadcast %cst_81 : f32 to vector<8x128xf32>
    %213 = arith.addf %211, %212 : vector<8x128xf32>
    %214 = arith.select %7, %209, %213 : vector<8x128xi1>, vector<8x128xf32>
    %215 = vector.extract_strided_slice %214 {offsets = [0, 0], sizes = [8, 32], strides = [1, 1]} : vector<8x128xf32> to vector<8x32xf32>
    %216 = vector.extract_strided_slice %214 {offsets = [0, 32], sizes = [8, 32], strides = [1, 1]} : vector<8x128xf32> to vector<8x32xf32>
    %217 = vector.extract_strided_slice %214 {offsets = [0, 64], sizes = [8, 32], strides = [1, 1]} : vector<8x128xf32> to vector<8x32xf32>
    %218 = vector.extract_strided_slice %214 {offsets = [0, 96], sizes = [8, 32], strides = [1, 1]} : vector<8x128xf32> to vector<8x32xf32>
    %219 = arith.mulf %216, %202 : vector<8x32xf32>
    %220 = arith.mulf %215, %217 : vector<8x32xf32>
    %221 = arith.addf %219, %220 : vector<8x32xf32>
    %222 = math.tanh %221 : vector<8x32xf32>
    %223 = arith.mulf %218, %222 : vector<8x32xf32>
    %c16_82 = arith.constant 16 : index
    %c0_83 = arith.constant 0 : index
    %224 = vector.load %arg12[%c16_82, %c0_83] : memref<64x128xf32, #tpu.memory_space<vmem>>, vector<8x128xf32>
    %cst_84 = arith.constant dense<0.000000e+00> : vector<8x128xf32>
    %225 = tpu.matmul %223, %1, %cst_84 {dimension_numbers = #tpu.dot_dimension_numbers<[1], [0], [0], [1], [0, 0, 1, 1], [], []>} : vector<8x32xf32>, vector<32x128xf32>, vector<8x128xf32> -> vector<8x128xf32>
    %226 = arith.addf %224, %225 : vector<8x128xf32>
    %227 = arith.mulf %226, %10 : vector<8x128xf32>
    %228 = math.tanh %227 : vector<8x128xf32>
    %cst_85 = arith.constant 5.000000e-01 : f32
    %229 = vector.broadcast %cst_85 : f32 to vector<8x128xf32>
    %230 = arith.mulf %229, %228 : vector<8x128xf32>
    %cst_86 = arith.constant 5.000000e-01 : f32
    %231 = vector.broadcast %cst_86 : f32 to vector<8x128xf32>
    %232 = arith.addf %230, %231 : vector<8x128xf32>
    %233 = arith.select %7, %228, %232 : vector<8x128xi1>, vector<8x128xf32>
    %234 = vector.extract_strided_slice %233 {offsets = [0, 0], sizes = [8, 32], strides = [1, 1]} : vector<8x128xf32> to vector<8x32xf32>
    %235 = vector.extract_strided_slice %233 {offsets = [0, 32], sizes = [8, 32], strides = [1, 1]} : vector<8x128xf32> to vector<8x32xf32>
    %236 = vector.extract_strided_slice %233 {offsets = [0, 64], sizes = [8, 32], strides = [1, 1]} : vector<8x128xf32> to vector<8x32xf32>
    %237 = vector.extract_strided_slice %233 {offsets = [0, 96], sizes = [8, 32], strides = [1, 1]} : vector<8x128xf32> to vector<8x32xf32>
    %238 = arith.mulf %235, %221 : vector<8x32xf32>
    %239 = arith.mulf %234, %236 : vector<8x32xf32>
    %240 = arith.addf %238, %239 : vector<8x32xf32>
    %241 = math.tanh %240 : vector<8x32xf32>
    %242 = arith.mulf %237, %241 : vector<8x32xf32>
    %c24_87 = arith.constant 24 : index
    %c0_88 = arith.constant 0 : index
    %243 = vector.load %arg12[%c24_87, %c0_88] : memref<64x128xf32, #tpu.memory_space<vmem>>, vector<8x128xf32>
    %cst_89 = arith.constant dense<0.000000e+00> : vector<8x128xf32>
    %244 = tpu.matmul %242, %1, %cst_89 {dimension_numbers = #tpu.dot_dimension_numbers<[1], [0], [0], [1], [0, 0, 1, 1], [], []>} : vector<8x32xf32>, vector<32x128xf32>, vector<8x128xf32> -> vector<8x128xf32>
    %245 = arith.addf %243, %244 : vector<8x128xf32>
    %246 = arith.mulf %245, %10 : vector<8x128xf32>
    %247 = math.tanh %246 : vector<8x128xf32>
    %cst_90 = arith.constant 5.000000e-01 : f32
    %248 = vector.broadcast %cst_90 : f32 to vector<8x128xf32>
    %249 = arith.mulf %248, %247 : vector<8x128xf32>
    %cst_91 = arith.constant 5.000000e-01 : f32
    %250 = vector.broadcast %cst_91 : f32 to vector<8x128xf32>
    %251 = arith.addf %249, %250 : vector<8x128xf32>
    %252 = arith.select %7, %247, %251 : vector<8x128xi1>, vector<8x128xf32>
    %253 = vector.extract_strided_slice %252 {offsets = [0, 0], sizes = [8, 32], strides = [1, 1]} : vector<8x128xf32> to vector<8x32xf32>
    %254 = vector.extract_strided_slice %252 {offsets = [0, 32], sizes = [8, 32], strides = [1, 1]} : vector<8x128xf32> to vector<8x32xf32>
    %255 = vector.extract_strided_slice %252 {offsets = [0, 64], sizes = [8, 32], strides = [1, 1]} : vector<8x128xf32> to vector<8x32xf32>
    %256 = vector.extract_strided_slice %252 {offsets = [0, 96], sizes = [8, 32], strides = [1, 1]} : vector<8x128xf32> to vector<8x32xf32>
    %257 = arith.mulf %254, %240 : vector<8x32xf32>
    %258 = arith.mulf %253, %255 : vector<8x32xf32>
    %259 = arith.addf %257, %258 : vector<8x32xf32>
    %260 = math.tanh %259 : vector<8x32xf32>
    %261 = arith.mulf %256, %260 : vector<8x32xf32>
    %c32_92 = arith.constant 32 : index
    %c0_93 = arith.constant 0 : index
    %262 = vector.load %arg12[%c32_92, %c0_93] : memref<64x128xf32, #tpu.memory_space<vmem>>, vector<8x128xf32>
    %cst_94 = arith.constant dense<0.000000e+00> : vector<8x128xf32>
    %263 = tpu.matmul %261, %1, %cst_94 {dimension_numbers = #tpu.dot_dimension_numbers<[1], [0], [0], [1], [0, 0, 1, 1], [], []>} : vector<8x32xf32>, vector<32x128xf32>, vector<8x128xf32> -> vector<8x128xf32>
    %264 = arith.addf %262, %263 : vector<8x128xf32>
    %265 = arith.mulf %264, %10 : vector<8x128xf32>
    %266 = math.tanh %265 : vector<8x128xf32>
    %cst_95 = arith.constant 5.000000e-01 : f32
    %267 = vector.broadcast %cst_95 : f32 to vector<8x128xf32>
    %268 = arith.mulf %267, %266 : vector<8x128xf32>
    %cst_96 = arith.constant 5.000000e-01 : f32
    %269 = vector.broadcast %cst_96 : f32 to vector<8x128xf32>
    %270 = arith.addf %268, %269 : vector<8x128xf32>
    %271 = arith.select %7, %266, %270 : vector<8x128xi1>, vector<8x128xf32>
    %272 = vector.extract_strided_slice %271 {offsets = [0, 0], sizes = [8, 32], strides = [1, 1]} : vector<8x128xf32> to vector<8x32xf32>
    %273 = vector.extract_strided_slice %271 {offsets = [0, 32], sizes = [8, 32], strides = [1, 1]} : vector<8x128xf32> to vector<8x32xf32>
    %274 = vector.extract_strided_slice %271 {offsets = [0, 64], sizes = [8, 32], strides = [1, 1]} : vector<8x128xf32> to vector<8x32xf32>
    %275 = vector.extract_strided_slice %271 {offsets = [0, 96], sizes = [8, 32], strides = [1, 1]} : vector<8x128xf32> to vector<8x32xf32>
    %276 = arith.mulf %273, %259 : vector<8x32xf32>
    %277 = arith.mulf %272, %274 : vector<8x32xf32>
    %278 = arith.addf %276, %277 : vector<8x32xf32>
    %279 = math.tanh %278 : vector<8x32xf32>
    %280 = arith.mulf %275, %279 : vector<8x32xf32>
    %c40_97 = arith.constant 40 : index
    %c0_98 = arith.constant 0 : index
    %281 = vector.load %arg12[%c40_97, %c0_98] : memref<64x128xf32, #tpu.memory_space<vmem>>, vector<8x128xf32>
    %cst_99 = arith.constant dense<0.000000e+00> : vector<8x128xf32>
    %282 = tpu.matmul %280, %1, %cst_99 {dimension_numbers = #tpu.dot_dimension_numbers<[1], [0], [0], [1], [0, 0, 1, 1], [], []>} : vector<8x32xf32>, vector<32x128xf32>, vector<8x128xf32> -> vector<8x128xf32>
    %283 = arith.addf %281, %282 : vector<8x128xf32>
    %284 = arith.mulf %283, %10 : vector<8x128xf32>
    %285 = math.tanh %284 : vector<8x128xf32>
    %cst_100 = arith.constant 5.000000e-01 : f32
    %286 = vector.broadcast %cst_100 : f32 to vector<8x128xf32>
    %287 = arith.mulf %286, %285 : vector<8x128xf32>
    %cst_101 = arith.constant 5.000000e-01 : f32
    %288 = vector.broadcast %cst_101 : f32 to vector<8x128xf32>
    %289 = arith.addf %287, %288 : vector<8x128xf32>
    %290 = arith.select %7, %285, %289 : vector<8x128xi1>, vector<8x128xf32>
    %291 = vector.extract_strided_slice %290 {offsets = [0, 0], sizes = [8, 32], strides = [1, 1]} : vector<8x128xf32> to vector<8x32xf32>
    %292 = vector.extract_strided_slice %290 {offsets = [0, 32], sizes = [8, 32], strides = [1, 1]} : vector<8x128xf32> to vector<8x32xf32>
    %293 = vector.extract_strided_slice %290 {offsets = [0, 64], sizes = [8, 32], strides = [1, 1]} : vector<8x128xf32> to vector<8x32xf32>
    %294 = vector.extract_strided_slice %290 {offsets = [0, 96], sizes = [8, 32], strides = [1, 1]} : vector<8x128xf32> to vector<8x32xf32>
    %295 = arith.mulf %292, %278 : vector<8x32xf32>
    %296 = arith.mulf %291, %293 : vector<8x32xf32>
    %297 = arith.addf %295, %296 : vector<8x32xf32>
    %298 = math.tanh %297 : vector<8x32xf32>
    %299 = arith.mulf %294, %298 : vector<8x32xf32>
    %c48_102 = arith.constant 48 : index
    %c0_103 = arith.constant 0 : index
    %300 = vector.load %arg12[%c48_102, %c0_103] : memref<64x128xf32, #tpu.memory_space<vmem>>, vector<8x128xf32>
    %cst_104 = arith.constant dense<0.000000e+00> : vector<8x128xf32>
    %301 = tpu.matmul %299, %1, %cst_104 {dimension_numbers = #tpu.dot_dimension_numbers<[1], [0], [0], [1], [0, 0, 1, 1], [], []>} : vector<8x32xf32>, vector<32x128xf32>, vector<8x128xf32> -> vector<8x128xf32>
    %302 = arith.addf %300, %301 : vector<8x128xf32>
    %303 = arith.mulf %302, %10 : vector<8x128xf32>
    %304 = math.tanh %303 : vector<8x128xf32>
    %cst_105 = arith.constant 5.000000e-01 : f32
    %305 = vector.broadcast %cst_105 : f32 to vector<8x128xf32>
    %306 = arith.mulf %305, %304 : vector<8x128xf32>
    %cst_106 = arith.constant 5.000000e-01 : f32
    %307 = vector.broadcast %cst_106 : f32 to vector<8x128xf32>
    %308 = arith.addf %306, %307 : vector<8x128xf32>
    %309 = arith.select %7, %304, %308 : vector<8x128xi1>, vector<8x128xf32>
    %310 = vector.extract_strided_slice %309 {offsets = [0, 0], sizes = [8, 32], strides = [1, 1]} : vector<8x128xf32> to vector<8x32xf32>
    %311 = vector.extract_strided_slice %309 {offsets = [0, 32], sizes = [8, 32], strides = [1, 1]} : vector<8x128xf32> to vector<8x32xf32>
    %312 = vector.extract_strided_slice %309 {offsets = [0, 64], sizes = [8, 32], strides = [1, 1]} : vector<8x128xf32> to vector<8x32xf32>
    %313 = vector.extract_strided_slice %309 {offsets = [0, 96], sizes = [8, 32], strides = [1, 1]} : vector<8x128xf32> to vector<8x32xf32>
    %314 = arith.mulf %311, %297 : vector<8x32xf32>
    %315 = arith.mulf %310, %312 : vector<8x32xf32>
    %316 = arith.addf %314, %315 : vector<8x32xf32>
    %317 = math.tanh %316 : vector<8x32xf32>
    %318 = arith.mulf %313, %317 : vector<8x32xf32>
    %c56_107 = arith.constant 56 : index
    %c0_108 = arith.constant 0 : index
    %319 = vector.load %arg12[%c56_107, %c0_108] : memref<64x128xf32, #tpu.memory_space<vmem>>, vector<8x128xf32>
    %cst_109 = arith.constant dense<0.000000e+00> : vector<8x128xf32>
    %320 = tpu.matmul %318, %1, %cst_109 {dimension_numbers = #tpu.dot_dimension_numbers<[1], [0], [0], [1], [0, 0, 1, 1], [], []>} : vector<8x32xf32>, vector<32x128xf32>, vector<8x128xf32> -> vector<8x128xf32>
    %321 = arith.addf %319, %320 : vector<8x128xf32>
    %322 = arith.mulf %321, %10 : vector<8x128xf32>
    %323 = math.tanh %322 : vector<8x128xf32>
    %cst_110 = arith.constant 5.000000e-01 : f32
    %324 = vector.broadcast %cst_110 : f32 to vector<8x128xf32>
    %325 = arith.mulf %324, %323 : vector<8x128xf32>
    %cst_111 = arith.constant 5.000000e-01 : f32
    %326 = vector.broadcast %cst_111 : f32 to vector<8x128xf32>
    %327 = arith.addf %325, %326 : vector<8x128xf32>
    %328 = arith.select %7, %323, %327 : vector<8x128xi1>, vector<8x128xf32>
    %329 = vector.extract_strided_slice %328 {offsets = [0, 0], sizes = [8, 32], strides = [1, 1]} : vector<8x128xf32> to vector<8x32xf32>
    %330 = vector.extract_strided_slice %328 {offsets = [0, 32], sizes = [8, 32], strides = [1, 1]} : vector<8x128xf32> to vector<8x32xf32>
    %331 = vector.extract_strided_slice %328 {offsets = [0, 64], sizes = [8, 32], strides = [1, 1]} : vector<8x128xf32> to vector<8x32xf32>
    %332 = vector.extract_strided_slice %328 {offsets = [0, 96], sizes = [8, 32], strides = [1, 1]} : vector<8x128xf32> to vector<8x32xf32>
    %333 = arith.mulf %330, %316 : vector<8x32xf32>
    %334 = arith.mulf %329, %331 : vector<8x32xf32>
    %335 = arith.addf %333, %334 : vector<8x32xf32>
    %336 = math.tanh %335 : vector<8x32xf32>
    %337 = arith.mulf %332, %336 : vector<8x32xf32>
    %c0_112 = arith.constant 0 : index
    %c0_113 = arith.constant 0 : index
    %338 = vector.load %arg8[%c0_112, %c0_113] : memref<32x6xf32, #tpu.memory_space<vmem>>, vector<32x6xf32>
    %cst_114 = arith.constant dense<0.000000e+00> : vector<8x6xf32>
    %339 = tpu.matmul %337, %338, %cst_114 {dimension_numbers = #tpu.dot_dimension_numbers<[1], [0], [0], [1], [0, 0, 1, 1], [], []>} : vector<8x32xf32>, vector<32x6xf32>, vector<8x6xf32> -> vector<8x6xf32>
    %c0_115 = arith.constant 0 : index
    %c0_116 = arith.constant 0 : index
    %340 = vector.load %arg9[%c0_115, %c0_116] : memref<1x6xf32, #tpu.memory_space<vmem>>, vector<1x6xf32>
    %341 = vector.broadcast %340 : vector<1x6xf32> to vector<8x6xf32>
    %342 = arith.addf %339, %341 : vector<8x6xf32>
    %c0_117 = arith.constant 0 : index
    %c0_118 = arith.constant 0 : index
    %343 = vector.load %arg10[%c0_117, %c0_118] : memref<8x6xf32, #tpu.memory_space<vmem>>, vector<8x6xf32>
    tpu.vector_store %arg10[%c0_117, %c0_118], %342 {strides = array<i32>} : memref<8x6xf32, #tpu.memory_space<vmem>>, vector<8x6xf32>,
    return
  }
  func.func @transform_0(%arg0: i32) -> (i32, i32) {
    %c0_i32 = arith.constant 0 : i32
    %c0_i32_0 = arith.constant 0 : i32
    %c0_i32_1 = arith.constant 0 : i32
    return %c0_i32, %c0_i32_0 : i32, i32
  }
  func.func @transform_1(%arg0: i32) -> (i32, i32) {
    %c0_i32 = arith.constant 0 : i32
    %c0_i32_0 = arith.constant 0 : i32
    %c0_i32_1 = arith.constant 0 : i32
    return %c0_i32, %c0_i32_0 : i32, i32
  }
  func.func @transform_2(%arg0: i32) -> (i32, i32) {
    %c0_i32 = arith.constant 0 : i32
    %c0_i32_0 = arith.constant 0 : i32
    %c0_i32_1 = arith.constant 0 : i32
    return %c0_i32, %c0_i32_0 : i32, i32
  }
  func.func @transform_3(%arg0: i32) -> (i32, i32) {
    %c0_i32 = arith.constant 0 : i32
    %c0_i32_0 = arith.constant 0 : i32
    %c0_i32_1 = arith.constant 0 : i32
    return %c0_i32, %c0_i32_0 : i32, i32
  }
  func.func @transform_4(%arg0: i32) -> (i32, i32) {
    %c0_i32 = arith.constant 0 : i32
    %c0_i32_0 = arith.constant 0 : i32
    %c0_i32_1 = arith.constant 0 : i32
    return %c0_i32, %c0_i32_0 : i32, i32
  }
  func.func @transform_5(%arg0: i32) -> (i32, i32) {
    %c0_i32 = arith.constant 0 : i32
    %c0_i32_0 = arith.constant 0 : i32
    %c0_i32_1 = arith.constant 0 : i32
    return %c0_i32, %c0_i32_0 : i32, i32
  }
  func.func @transform_6(%arg0: i32) -> (i32, i32) {
    %c0_i32 = arith.constant 0 : i32
    %c0_i32_0 = arith.constant 0 : i32
    %c0_i32_1 = arith.constant 0 : i32
    return %c0_i32, %c0_i32_0 : i32, i32
  }
  func.func @transform_7(%arg0: i32) -> (i32, i32) {
    %c0_i32 = arith.constant 0 : i32
    %c0_i32_0 = arith.constant 0 : i32
    %c0_i32_1 = arith.constant 0 : i32
    return %c0_i32, %c0_i32_0 : i32, i32
  }
  func.func @transform_8(%arg0: i32) -> (i32, i32) {
    %c0_i32 = arith.constant 0 : i32
    %c0_i32_0 = arith.constant 0 : i32
    %c0_i32_1 = arith.constant 0 : i32
    return %c0_i32, %c0_i32_0 : i32, i32
  }
  func.func @transform_9(%arg0: i32) -> (i32, i32) {
    %c0_i32 = arith.constant 0 : i32
    %c0_i32_0 = arith.constant 0 : i32
    %c0_i32_1 = arith.constant 0 : i32
    return %c0_i32, %c0_i32_0 : i32, i32
  }
}

</mosaic_0001>

<bundles_post_ra>
// kernel: tpu_custom_call.1
= control target key start
LH: loop header
LB: loop body
LE: loop exit
PB: predicated region body
PF: predicated region fallthrough
CT: control target
= control target key end

     0   :  { %vm85_vm0 = vcmask 1043456   ;;  %vm60_vm1 = vcmask 31744   ;;  %s1618_s0 = inlined_call_operand.vmem [shape: f32[64,4], index: 0, kind: input, shape index: {}]   ;;  %s1619_s1 = inlined_call_operand.vmem [shape: f32[4,128], index: 1, kind: input, shape index: {}]   ;;  %s1620_s2 = inlined_call_operand.vmem [shape: f32[1,128], index: 2, kind: input, shape index: {}]   ;;  %s1621_s3 = inlined_call_operand.vmem [shape: f32[32,128], index: 3, kind: input, shape index: {}]   ;;  %s1622_s4 = inlined_call_operand.vmem [shape: f32[32,128], index: 4, kind: input, shape index: {}]   ;;  %s1623_s5 = inlined_call_operand.vmem [shape: f32[1,128], index: 5, kind: input, shape index: {}]   ;;  %s1624_s6 = inlined_call_operand.vmem [shape: f32[32,128], index: 6, kind: input, shape index: {}]   ;;  %s1625_s7 = inlined_call_operand.vmem [shape: f32[32,6], index: 7, kind: input, shape index: {}]   ;;  %s1626_s8 = inlined_call_operand.vmem [shape: f32[1,6], index: 8, kind: input, shape index: {}]   ;;  %s1627_s9 = inlined_call_operand.hbm [shape: f32[8,6], index: 9, kind: output, shape index: {}]  }
   0x1   :  { %v1263_v0 = vld [vmem:[%s1621_s3 + $0x18] sm:$0xff]  ;;  %v1268_v1 = vld [vmem:[%s1621_s3 + $0x10] sm:$0xff]  ;;  %v55_v2 = vld [vmem:[%s1619_s1] sm:$0xf] }
   0x2   :  { %155 = vmatpush.msra.mxu1 %v1263_v0  ;;  %1075 = vmatpush.msk.msra.mxu0 %vm85_vm0, %v55_v2  ;;  %v47_v3 = vld [vmem:[%s1618_s0] sm:$0xff]  ;;  %v1280_v4 = vld [vmem:[%s1621_s3 + $0x8] sm:$0xff] }
   0x3   :  { %1076 = vmatmul.msk.f32.vlgmr.msra.gmra.mxu0 %vm60_vm1, %v47_v3  ;;  %206 = vmatpush.msra.mxu2 %v1263_v0 }
   0x4   :  { %156 = vmatpush.msra.mxu1 %v1268_v1  ;;  %410 = vmatpush.msrb.mxu0 %v1263_v0 }
   0x5   :  { %14 = vsyncpa [#allocation6], 0  ;;  %v1289_v5 = vld [vmem:[%s1621_s3] sm:$0xff]  ;;  %207 = vmatpush.msra.mxu2 %v1268_v1  ;;  %v1205_v6 = vmov 0.0   ;;  %v41_v7 = vlaneseq  ;;  %v1206_v13 = vmov 0.5   ;;  %s1208_s21 = smov 32  }
   0x6   :  { %157 = vmatpush.msra.mxu1 %v1280_v4  ;;  %411 = vmatpush.msrb.mxu0 %v1268_v1  ;;  %v1315_v9 = vld [vmem:[%s1620_s2] ss:$0 sm:$0xff]  ;;  %s1207_s2 = smov 64   ;;  %v559_v30 = vld [vmem:[%s1622_s4 + $0x18] sm:$0xff]  ;;  %v558_v31 = vld [vmem:[%s1622_s4 + $0x10] sm:$0xff]  ;;  %vm139_vm5 = vcmask 261120  }
   0x7   :  { %208 = vmatpush.msra.mxu2 %v1280_v4  ;;  %v42_v8 = vand.u32 127, %v41_v7  ;;  %v48_v32 = vld [vmem:[%s1618_s0 + $0x8] sm:$0xff]  ;;  %600 = vmatpush.msra.mxu3 %v559_v30  ;;  %v556_v34 = vld [vmem:[%s1622_s4] sm:$0xff]  ;;  %v49_v54 = vld [vmem:[%s1618_s0 + $0x10] sm:$0xff]  ;;  %s1209_s15 = smov [#allocation5]   ;;  %s1066_s1 = sshll.u32 %s1627_s9, 4  ;;  %s1067_s1 = int_to_ptr.hbm [resolvable:$true] %s1066_s1 }
   0x8   :  { %158 = vmatpush.msra.mxu1 %v1289_v5  ;;  %412 = vmatpush.msrb.mxu0 %v1280_v4  ;;  %v557_v33 = vld [vmem:[%s1622_s4 + $0x8] sm:$0xff]  ;;  %v1026_v12 = vld [vmem:[%s1625_s7 + $0x10] sm:$0xff]  ;;  %s1064_s16 = sshll.u32 %s1209_s15, 4  ;;  %vm1057_vm6 = vcmask 48128   ;;  %s1065_s16 = int_to_ptr.vmem [resolvable:$true] %s1064_s16 }
   0x9   :  { %159 = vmatmul.f32.vlgmr.msra.gmra.mxu1 %v1205_v6  ;;  %209 = vmatpush.msra.mxu2 %v1289_v5  ;;  %vm43_vm2 = vcmp.ge.s32.totalorder %v42_v8, 64  ;;  %vm44_vm3 = vcmp.lt.s32.totalorder %v42_v8, 96 }
   0xa   :  { %308 = vmatpush.msrb.mxu1 %v1263_v0  ;;  %413 = vmatpush.msrb.mxu0 %v1289_v5  ;;  %vm1318_vm4 = vmand %vm43_vm2, %vm44_vm3 }
   0xb   :  { %257 = vmatpush.msrb.mxu2 %v1263_v0  ;;  %v1324_v14 = vsel %vm1318_vm4, 1.0, %v1206_v13  ;;  %1077 = vmatmul.msk.f32.gmra.mxu0 %vm60_vm1, %v48_v32 }
   0xc   :  { %309 = vmatpush.msrb.mxu1 %v1268_v1  ;;  %601 = vmatpush.msra.mxu3 %v558_v31 }
   0xd   :  { %258 = vmatpush.msrb.mxu2 %v1268_v1 }
   0xe   :  { %310 = vmatpush.msrb.mxu1 %v1280_v4  ;;  %602 = vmatpush.msra.mxu3 %v557_v33 }
   0xf   :  { %259 = vmatpush.msrb.mxu2 %v1280_v4 }
  0x10   :  { %311 = vmatpush.msrb.mxu1 %v1289_v5  ;;  %603 = vmatpush.msra.mxu3 %v556_v34  ;;  %v51_v34 = vld [vmem:[%s1618_s0 + $0x20] sm:$0xff] }
  0x11   :  { %260 = vmatpush.msrb.mxu2 %v1289_v5 }
  0x12   :  { %461 = vmatpush.msra.mxu1 %v1263_v0 }
  0x13   :  { %1078 = vmatmul.msk.f32.gmra.mxu0 %vm60_vm1, %v49_v54  ;;  %v54_v54 = vld [vmem:[%s1618_s0 + $0x38] sm:$0xff] }
  0x14   :  { %462 = vmatpush.msra.mxu1 %v1268_v1 }
  0x16   :  { %463 = vmatpush.msra.mxu1 %v1280_v4 }
  0x18   :  { %464 = vmatpush.msra.mxu1 %v1289_v5 }
  0x80   :  { %v106_v10 = vpop.f32.mrf.mxu0 }
  0x81   :  { %v107_v11 = vadd.f32 %v1315_v9, %v106_v10  ;;  %v50_v10 = vld [vmem:[%s1618_s0 + $0x18] sm:$0xff] }
  0x82   :  { %1079 = vmatmul.msk.f32.gmra.mxu0 %vm60_vm1, %v50_v10 }
  0x86   :  { %v160_v15 = vpop.f32.mrf.mxu1 }
  0x87   :  { %v163_v16 = vadd.f32 %v160_v15, %v107_v11 }
  0x88   :  { %v109_v37 = vpop.f32.mrf.mxu0 }
  0x89   :  { %v164_v17 = vmul.f32 %v163_v16, %v1324_v14  ;;  %v110_v38 = vadd.f32 %v1315_v9, %v109_v37 }
  0x8a   :  { %1080 = vmatmul.msk.f32.gmra.mxu0 %vm60_vm1, %v51_v34 }
  0x8b   :  { %1115 = vtanh.f32 %v164_v17 }
  0x90   :  { %v112_v57 = vpop.f32.mrf.mxu0 }
  0x91   :  { %v1116_v18 = vpop.eup %1115  ;;  %v113_v58 = vadd.f32 %v1315_v9, %v112_v57 }
  0x92   :  { %v166_v19 = vmul.f32 0.5, %v1116_v18 }
  0x94   :  { %v167_v20 = vadd.f32 0.5, %v166_v19 }
  0x96   :  { %v168_v21 = vsel %vm1318_vm4, %v1116_v18, %v167_v20 }
  0x97   :  { %171 = vrot.lane.b32.xlu0 %v168_v21, %s1207_s2  ;;  %v169_v24 = vmul.f32 0.0, %v168_v21 }
  0xff   :  { %v115_v17 = vpop.f32.mrf.mxu0 }
 0x100   :  { %v116_v18 = vadd.f32 %v1315_v9, %v115_v17 }
 0x107   :  { %v118_v37 = vpop.f32.mrf.mxu0 }
 0x109   :  { %v172_v22 = vpop.permute.xlu0 %171 }
 0x10a   :  { %v174_v23 = vmul.f32 %v172_v22, %v168_v21 }
 0x10c   :  { %176 = vrot.lane.b32.xlu0 %v174_v23, %s1208_s21 }
 0x17e   :  { %v177_v25 = vpop.permute.xlu0 %176 }
 0x17f   :  { %v179_v26 = vadd.f32 %v177_v25, %v169_v24 }
 0x181   :  { %1117 = vtanh.f32 %v179_v26 }
 0x187   :  { %v1118_v27 = vpop.eup %1117 }
 0x188   :  { %182 = vrot.lane.b32.xlu1 %v1118_v27, %s1207_s2 }
 0x1fa   :  { %v183_v28 = vpop.permute.xlu1 %182 }
 0x1fb   :  { %v185_v29 = vmul.f32 %v183_v28, %v168_v21 }
 0x1fd   :  { %187 = vrot.lane.b32.xlu1 %v185_v29, %s1208_s21 }
 0x26f   :  { %v188_v35 = vpop.permute.xlu1 %187 }
 0x270   :  { %190 = vst.msk [vmem:[#allocation4] sm:$0xff] %vm139_vm5, %v188_v35  ;;  %1084 = vmatmul.msk.f32.vlgmr.msra.gmra.mxu2 %vm139_vm5, %v188_v35 }
 0x271   :  { %359 = vmatpush.msra.mxu2 %v1263_v0 }
 0x273   :  { %360 = vmatpush.msra.mxu2 %v1268_v1 }
 0x275   :  { %361 = vmatpush.msra.mxu2 %v1280_v4 }
 0x277   :  { %v548_v36 = vld [vmem:[#allocation4] sm:$0xff]  ;;  %362 = vmatpush.msra.mxu2 %v1289_v5 }
 0x278   :  { %1091 = vmatmul.msk.f32.vlgmr.msra.gmra.mxu3 %vm139_vm5, %v548_v36 }
 0x2f3   :  { %v211_v39 = vpop.f32.mrf.mxu2 }
 0x2f4   :  { %v214_v40 = vadd.f32 %v211_v39, %v110_v38  ;;  %v119_v38 = vadd.f32 %v1315_v9, %v118_v37 }
 0x2f6   :  { %v215_v41 = vmul.f32 %v214_v40, %v1324_v14 }
 0x2f8   :  { %1119 = vtanh.f32 %v215_v41 }
 0x2fe   :  { %v1120_v42 = vpop.eup %1119 }
 0x2ff   :  { %v217_v43 = vmul.f32 0.5, %v1120_v42 }
 0x301   :  { %v218_v44 = vadd.f32 0.5, %v217_v43 }
 0x303   :  { %v219_v45 = vsel %vm1318_vm4, %v1120_v42, %v218_v44 }
 0x304   :  { %222 = vrot.lane.b32.xlu2 %v219_v45, %s1207_s2  ;;  %v220_v48 = vmul.f32 %v219_v45, %v179_v26 }
 0x35e   :  { %v223_v46 = vpop.permute.xlu2 %222 }
 0x35f   :  { %v225_v47 = vmul.f32 %v223_v46, %v219_v45 }
 0x361   :  { %227 = vrot.lane.b32.xlu2 %v225_v47, %s1208_s21 }
 0x3bb   :  { %v228_v49 = vpop.permute.xlu2 %227 }
 0x3bc   :  { %v230_v50 = vadd.f32 %v228_v49, %v220_v48 }
 0x3be   :  { %1121 = vtanh.f32 %v230_v50 }
 0x3c4   :  { %v1122_v51 = vpop.eup %1121 }
 0x3c5   :  { %233 = vrot.lane.b32.xlu0 %v1122_v51, %s1207_s2 }
 0x437   :  { %v234_v52 = vpop.permute.xlu0 %233 }
 0x438   :  { %v236_v53 = vmul.f32 %v234_v52, %v219_v45  ;;  %v52_v52 = vld [vmem:[%s1618_s0 + $0x28] sm:$0xff] }
 0x439   :  { %1081 = vmatmul.msk.f32.gmra.mxu0 %vm60_vm1, %v52_v52 }
 0x43a   :  { %238 = vrot.lane.b32.xlu1 %v236_v53, %s1208_s21  ;;  %v53_v53 = vld [vmem:[%s1618_s0 + $0x30] sm:$0xff] }
 0x441   :  { %1082 = vmatmul.msk.f32.gmra.mxu0 %vm60_vm1, %v53_v53 }
 0x449   :  { %1083 = vmatmul.msk.f32.gmra.mxu0 %vm60_vm1, %v54_v54 }
 0x4ac   :  { %v239_v55 = vpop.permute.xlu1 %238 }
 0x4ad   :  { %241 = vst.msk [vmem:[#allocation4 + $0x8] sm:$0xff] %vm139_vm5, %v239_v55  ;;  %1085 = vmatmul.msk.f32.vlgmr.msrb.gmra.mxu2 %vm139_vm5, %v239_v55 }
 0x4ae   :  { %512 = vmatpush.msrb.mxu2 %v1263_v0 }
 0x4b0   :  { %513 = vmatpush.msrb.mxu2 %v1268_v1 }
 0x4b2   :  { %514 = vmatpush.msrb.mxu2 %v1280_v4 }
 0x4b4   :  { %v549_v56 = vld [vmem:[#allocation4 + $0x8] sm:$0xff]  ;;  %515 = vmatpush.msrb.mxu2 %v1289_v5 }
 0x4b5   :  { %1092 = vmatmul.msk.f32.gmra.mxu3 %vm139_vm5, %v549_v56 }
 0x530   :  { %v262_v59 = vpop.f32.mrf.mxu2 }
 0x531   :  { %v265_v60 = vadd.f32 %v262_v59, %v113_v58  ;;  %v121_v59 = vpop.f32.mrf.mxu0 }
 0x533   :  { %v266_v61 = vmul.f32 %v265_v60, %v1324_v14 }
 0x535   :  { %1123 = vtanh.f32 %v266_v61 }
 0x539   :  { %v124_v60 = vpop.f32.mrf.mxu0 }
 0x53b   :  { %v1124_v62 = vpop.eup %1123 }
 0x53c   :  { %v268_v63 = vmul.f32 0.5, %v1124_v62 }
 0x53e   :  { %v269_v0 = vadd.f32 0.5, %v268_v63 }
 0x540   :  { %v270_v1 = vsel %vm1318_vm4, %v1124_v62, %v269_v0  ;;  %v122_v62 = vadd.f32 %v1315_v9, %v121_v59 }
 0x541   :  { %273 = vrot.lane.b32.xlu2 %v270_v1, %s1207_s2  ;;  %v271_v4 = vmul.f32 %v270_v1, %v230_v50  ;;  %v1428_v61 = vpop.f32.mrf.mxu0 }
 0x59b   :  { %v274_v2 = vpop.permute.xlu2 %273 }
 0x59c   :  { %v276_v3 = vmul.f32 %v274_v2, %v270_v1 }
 0x59e   :  { %278 = vrot.lane.b32.xlu0 %v276_v3, %s1208_s21 }
 0x610   :  { %v279_v5 = vpop.permute.xlu0 %278 }
 0x611   :  { %v281_v7 = vadd.f32 %v279_v5, %v271_v4 }
 0x613   :  { %1125 = vtanh.f32 %v281_v7 }
 0x619   :  { %v1126_v8 = vpop.eup %1125 }
 0x61a   :  { %284 = vrot.lane.b32.xlu1 %v1126_v8, %s1207_s2 }
 0x68c   :  { %v285_v11 = vpop.permute.xlu1 %284 }
 0x68d   :  { %v287_v13 = vmul.f32 %v285_v11, %v270_v1 }
 0x68f   :  { %289 = vrot.lane.b32.xlu2 %v287_v13, %s1208_s21 }
 0x6e9   :  { %v290_v15 = vpop.permute.xlu2 %289 }
 0x6ea   :  { %292 = vst.msk [vmem:[#allocation4 + $0x10] sm:$0xff] %vm139_vm5, %v290_v15  ;;  %1086 = vmatmul.msk.f32.vlgmr.msrb.gmra.mxu1 %vm139_vm5, %v290_v15 }
 0x6f1   :  { %v550_v16 = vld [vmem:[#allocation4 + $0x10] sm:$0xff] }
 0x6f2   :  { %1093 = vmatmul.msk.f32.gmra.mxu3 %vm139_vm5, %v550_v16 }
 0x767   :  { %v313_v19 = vpop.f32.mrf.mxu1 }
 0x768   :  { %v316_v20 = vadd.f32 %v313_v19, %v116_v18  ;;  %v1441_v18 = vld [vmem:[%s1624_s6 + $0x18] sm:$0xff]  ;;  %v1446_v19 = vld [vmem:[%s1624_s6 + $0x10] sm:$0xff] }
 0x769   :  { %650 = vmatpush.msrb.mxu1 %v1441_v18 }
 0x76a   :  { %v317_v21 = vmul.f32 %v316_v20, %v1324_v14  ;;  %v1453_v20 = vld [vmem:[%s1624_s6 + $0x8] sm:$0xff] }
 0x76b   :  { %651 = vmatpush.msrb.mxu1 %v1446_v19 }
 0x76c   :  { %1127 = vtanh.f32 %v317_v21  ;;  %v1460_v21 = vld [vmem:[%s1624_s6] sm:$0xff] }
 0x76d   :  { %652 = vmatpush.msrb.mxu1 %v1453_v20 }
 0x76f   :  { %653 = vmatpush.msrb.mxu1 %v1460_v21 }
 0x772   :  { %v1128_v22 = vpop.eup %1127 }
 0x773   :  { %v319_v23 = vmul.f32 0.5, %v1128_v22 }
 0x775   :  { %v320_v24 = vadd.f32 0.5, %v319_v23 }
 0x777   :  { %v321_v25 = vsel %vm1318_vm4, %v1128_v22, %v320_v24  ;;  %v125_v24 = vadd.f32 %v1315_v9, %v124_v60 }
 0x778   :  { %324 = vrot.lane.b32.xlu0 %v321_v25, %s1207_s2  ;;  %v322_v28 = vmul.f32 %v321_v25, %v281_v7 }
 0x7ea   :  { %v325_v26 = vpop.permute.xlu0 %324 }
 0x7eb   :  { %v327_v27 = vmul.f32 %v325_v26, %v321_v25 }
 0x7ed   :  { %329 = vrot.lane.b32.xlu1 %v327_v27, %s1208_s21  ;;  %v1482_v27 = vld [vmem:[%s1623_s5] ss:$0 sm:$0xff] }
 0x85f   :  { %v330_v29 = vpop.permute.xlu1 %329 }
 0x860   :  { %v332_v30 = vadd.f32 %v330_v29, %v322_v28 }
 0x862   :  { %1129 = vtanh.f32 %v332_v30 }
 0x868   :  { %v1130_v31 = vpop.eup %1129 }
 0x869   :  { %335 = vrot.lane.b32.xlu2 %v1130_v31, %s1207_s2 }
 0x8c3   :  { %v336_v32 = vpop.permute.xlu2 %335 }
 0x8c4   :  { %v338_v33 = vmul.f32 %v336_v32, %v321_v25 }
 0x8c6   :  { %340 = vrot.lane.b32.xlu0 %v338_v33, %s1208_s21 }
 0x938   :  { %v341_v35 = vpop.permute.xlu0 %340 }
 0x939   :  { %343 = vst.msk [vmem:[#allocation4 + $0x18] sm:$0xff] %vm139_vm5, %v341_v35  ;;  %1087 = vmatmul.msk.f32.vlgmr.msra.gmra.mxu2 %vm139_vm5, %v341_v35 }
 0x93a   :  { %699 = vmatpush.msra.mxu2 %v1441_v18 }
 0x93c   :  { %700 = vmatpush.msra.mxu2 %v1446_v19 }
 0x93e   :  { %701 = vmatpush.msra.mxu2 %v1453_v20 }
 0x940   :  { %v551_v36 = vld [vmem:[#allocation4 + $0x18] sm:$0xff]  ;;  %702 = vmatpush.msra.mxu2 %v1460_v21 }
 0x941   :  { %1094 = vmatmul.msk.f32.gmra.mxu3 %vm139_vm5, %v551_v36 }
 0x9bc   :  { %v364_v39 = vpop.f32.mrf.mxu2 }
 0x9bd   :  { %v367_v40 = vadd.f32 %v364_v39, %v119_v38 }
 0x9bf   :  { %v368_v41 = vmul.f32 %v367_v40, %v1324_v14 }
 0x9c1   :  { %1131 = vtanh.f32 %v368_v41 }
 0x9c7   :  { %v1132_v42 = vpop.eup %1131 }
 0x9c8   :  { %v370_v43 = vmul.f32 0.5, %v1132_v42 }
 0x9ca   :  { %v371_v44 = vadd.f32 0.5, %v370_v43 }
 0x9cc   :  { %v372_v45 = vsel %vm1318_vm4, %v1132_v42, %v371_v44 }
 0x9cd   :  { %375 = vrot.lane.b32.xlu1 %v372_v45, %s1207_s2  ;;  %v373_v48 = vmul.f32 %v372_v45, %v332_v30 }
 0xa3f   :  { %v376_v46 = vpop.permute.xlu1 %375 }
 0xa40   :  { %v378_v47 = vmul.f32 %v376_v46, %v372_v45 }
 0xa42   :  { %380 = vrot.lane.b32.xlu2 %v378_v47, %s1208_s21 }
 0xa9c   :  { %v381_v49 = vpop.permute.xlu2 %380 }
 0xa9d   :  { %v383_v50 = vadd.f32 %v381_v49, %v373_v48 }
 0xa9f   :  { %1133 = vtanh.f32 %v383_v50 }
 0xaa5   :  { %v1134_v51 = vpop.eup %1133 }
 0xaa6   :  { %386 = vrot.lane.b32.xlu0 %v1134_v51, %s1207_s2 }
 0xb18   :  { %v387_v55 = vpop.permute.xlu0 %386 }
 0xb19   :  { %v389_v56 = vmul.f32 %v387_v55, %v372_v45 }
 0xb1b   :  { %391 = vrot.lane.b32.xlu1 %v389_v56, %s1208_s21 }
 0xb8d   :  { %v392_v57 = vpop.permute.xlu1 %391 }
 0xb8e   :  { %394 = vst.msk [vmem:[#allocation4 + $0x20] sm:$0xff] %vm139_vm5, %v392_v57  ;;  %1088 = vmatmul.msk.f32.vlgmr.msrb.gmra.mxu0 %vm139_vm5, %v392_v57 }
 0xb95   :  { %v552_v58 = vld [vmem:[#allocation4 + $0x20] sm:$0xff] }
 0xb96   :  { %1095 = vmatmul.msk.f32.gmra.mxu3 %vm139_vm5, %v552_v58 }
 0xc0b   :  { %v415_v63 = vpop.f32.mrf.mxu0 }
 0xc0c   :  { %v418_v0 = vadd.f32 %v415_v63, %v122_v62 }
 0xc0e   :  { %v419_v1 = vmul.f32 %v418_v0, %v1324_v14 }
 0xc10   :  { %1135 = vtanh.f32 %v419_v1 }
 0xc16   :  { %v1136_v2 = vpop.eup %1135 }
 0xc17   :  { %v421_v3 = vmul.f32 0.5, %v1136_v2 }
 0xc19   :  { %v422_v4 = vadd.f32 0.5, %v421_v3 }
 0xc1b   :  { %v423_v5 = vsel %vm1318_vm4, %v1136_v2, %v422_v4 }
 0xc1c   :  { %426 = vrot.lane.b32.xlu2 %v423_v5, %s1207_s2  ;;  %v424_v10 = vmul.f32 %v423_v5, %v383_v50 }
 0xc76   :  { %v427_v7 = vpop.permute.xlu2 %426 }
 0xc77   :  { %v429_v8 = vmul.f32 %v427_v7, %v423_v5 }
 0xc79   :  { %431 = vrot.lane.b32.xlu0 %v429_v8, %s1208_s21 }
 0xceb   :  { %v432_v11 = vpop.permute.xlu0 %431 }
 0xcec   :  { %v434_v13 = vadd.f32 %v432_v11, %v424_v10 }
 0xcee   :  { %1137 = vtanh.f32 %v434_v13 }
 0xcf4   :  { %v1138_v15 = vpop.eup %1137 }
 0xcf5   :  { %437 = vrot.lane.b32.xlu1 %v1138_v15, %s1207_s2 }
 0xd67   :  { %v438_v16 = vpop.permute.xlu1 %437 }
 0xd68   :  { %v440_v17 = vmul.f32 %v438_v16, %v423_v5 }
 0xd6a   :  { %442 = vrot.lane.b32.xlu2 %v440_v17, %s1208_s21 }
 0xdc4   :  { %v443_v22 = vpop.permute.xlu2 %442 }
 0xdc5   :  { %445 = vst.msk [vmem:[#allocation4 + $0x28] sm:$0xff] %vm139_vm5, %v443_v22  ;;  %1089 = vmatmul.msk.f32.vlgmr.msra.gmra.mxu1 %vm139_vm5, %v443_v22 }
 0xdc6   :  { %748 = vmatpush.msra.mxu1 %v1441_v18 }
 0xdc8   :  { %749 = vmatpush.msra.mxu1 %v1446_v19 }
 0xdca   :  { %750 = vmatpush.msra.mxu1 %v1453_v20 }
 0xdcc   :  { %v553_v23 = vld [vmem:[#allocation4 + $0x28] sm:$0xff]  ;;  %751 = vmatpush.msra.mxu1 %v1460_v21 }
 0xdcd   :  { %1096 = vmatmul.msk.f32.gmra.mxu3 %vm139_vm5, %v553_v23  ;;  %654 = vmatmul.f32.vlgmr.msrb.gmra.mxu1 %v1205_v6  ;;  %v605_v6 = vpop.f32.mrf.mxu3 }
 0xdce   :  { %846 = vmatpush.msrb.mxu1 %v1441_v18  ;;  %v606_v29 = vadd.f32 %v1482_v27, %v605_v6 }
 0xdd0   :  { %847 = vmatpush.msrb.mxu1 %v1446_v19 }
 0xdd2   :  { %848 = vmatpush.msrb.mxu1 %v1453_v20 }
 0xdd4   :  { %849 = vmatpush.msrb.mxu1 %v1460_v21 }
 0xdd5   :  { %v608_v62 = vpop.f32.mrf.mxu3 }
 0xdd6   :  { %v609_v63 = vadd.f32 %v1482_v27, %v608_v62 }
 0xe42   :  { %v466_v25 = vpop.f32.mrf.mxu1 }
 0xe43   :  { %v469_v26 = vadd.f32 %v466_v25, %v125_v24  ;;  %v611_v24 = vpop.f32.mrf.mxu3 }
 0xe44   :  { %v612_v25 = vadd.f32 %v1482_v27, %v611_v24 }
 0xe45   :  { %v470_v28 = vmul.f32 %v469_v26, %v1324_v14 }
 0xe47   :  { %1139 = vtanh.f32 %v470_v28 }
 0xe4a   :  { %v655_v30 = vpop.f32.mrf.mxu1 }
 0xe4b   :  { %v658_v31 = vadd.f32 %v655_v30, %v606_v29 }
 0xe4d   :  { %v1140_v32 = vpop.eup %1139  ;;  %v659_v33 = vmul.f32 %v658_v31, %v1324_v14 }
 0xe4e   :  { %v472_v34 = vmul.f32 0.5, %v1140_v32 }
 0xe4f   :  { %1141 = vtanh.f32 %v659_v33 }
 0xe50   :  { %v473_v35 = vadd.f32 0.5, %v472_v34 }
 0xe52   :  { %v474_v36 = vsel %vm1318_vm4, %v1140_v32, %v473_v35 }
 0xe53   :  { %477 = vrot.lane.b32.xlu0 %v474_v36, %s1207_s2  ;;  %v475_v45 = vmul.f32 %v474_v36, %v434_v13 }
 0xe55   :  { %v1142_v37 = vpop.eup %1141 }
 0xe56   :  { %v661_v38 = vmul.f32 0.5, %v1142_v37 }
 0xe58   :  { %v662_v39 = vadd.f32 0.5, %v661_v38 }
 0xe5a   :  { %v663_v40 = vsel %vm1318_vm4, %v1142_v37, %v662_v39 }
 0xe5b   :  { %666 = vrot.lane.b32.xlu1 %v663_v40, %s1207_s2  ;;  %v664_v49 = vmul.f32 0.0, %v663_v40 }
 0xec5   :  { %v478_v41 = vpop.permute.xlu0 %477 }
 0xec6   :  { %v480_v42 = vmul.f32 %v478_v41, %v474_v36 }
 0xec8   :  { %482 = vrot.lane.b32.xlu2 %v480_v42, %s1208_s21  ;;  %v614_v42 = vpop.f32.mrf.mxu3 }
 0xecd   :  { %v667_v43 = vpop.permute.xlu1 %666 }
 0xece   :  { %v669_v44 = vmul.f32 %v667_v43, %v663_v40  ;;  %v615_v43 = vadd.f32 %v1482_v27, %v614_v42 }
 0xed0   :  { %671 = vrot.lane.b32.xlu0 %v669_v44, %s1208_s21 }
 0xf22   :  { %v483_v46 = vpop.permute.xlu2 %482 }
 0xf23   :  { %v1495_v47 = vadd.f32 %v483_v46, %v475_v45 }
 0xf25   :  { %1143 = vtanh.f32 %v1495_v47 }
 0xf2b   :  { %v1144_v48 = vpop.eup %1143 }
 0xf2c   :  { %488 = vrot.lane.b32.xlu1 %v1144_v48, %s1207_s2 }
 0xf42   :  { %v672_v50 = vpop.permute.xlu0 %671 }
 0xf43   :  { %v674_v51 = vadd.f32 %v672_v50, %v664_v49 }
 0xf45   :  { %1145 = vtanh.f32 %v674_v51 }
 0xf4b   :  { %v1146_v52 = vpop.eup %1145 }
 0xf4c   :  { %677 = vrot.lane.b32.xlu2 %v1146_v52, %s1207_s2 }
 0xf9e   :  { %v489_v53 = vpop.permute.xlu1 %488 }
 0xf9f   :  { %v491_v54 = vmul.f32 %v489_v53, %v474_v36 }
 0xfa1   :  { %493 = vrot.lane.b32.xlu0 %v491_v54, %s1208_s21 }
 0xfa6   :  { %v678_v55 = vpop.permute.xlu2 %677 }
 0xfa7   :  { %v680_v56 = vmul.f32 %v678_v55, %v663_v40 }
 0xfa9   :  { %683 = vrot.lane.b32.xlu1 %v680_v56, %s1208_s21 }
0x1013   :  { %v494_v57 = vpop.permute.xlu0 %493 }
0x1014   :  { %496 = vst.msk [vmem:[#allocation4 + $0x30] sm:$0xff] %vm139_vm5, %v494_v57  ;;  %1090 = vmatmul.msk.f32.vlgmr.msrb.gmra.mxu2 %vm139_vm5, %v494_v57  ;;  %v617_v57 = vpop.f32.mrf.mxu3 }
0x1015   :  { %797 = vmatpush.msrb.mxu2 %v1441_v18 }
0x1017   :  { %798 = vmatpush.msrb.mxu2 %v1446_v19 }
0x1019   :  { %799 = vmatpush.msrb.mxu2 %v1453_v20 }
0x101b   :  { %v684_v58 = vpop.permute.xlu1 %683  ;;  %v554_v59 = vld [vmem:[#allocation4 + $0x30] sm:$0xff]  ;;  %800 = vmatpush.msrb.mxu2 %v1460_v21 }
0x101c   :  { %1097 = vmatmul.msk.f32.gmra.mxu3 %vm139_vm5, %v554_v59  ;;  %1099 = vmatmul.msk.f32.vlgmr.msra.gmra.mxu2 %vm139_vm5, %v684_v58  ;;  %v618_v58 = vadd.f32 %v1482_v27, %v617_v57 }
0x101d   :  { %895 = vmatpush.msra.mxu2 %v1441_v18 }
0x101f   :  { %896 = vmatpush.msra.mxu2 %v1446_v19 }
0x1021   :  { %897 = vmatpush.msra.mxu2 %v1453_v20 }
0x1023   :  { %898 = vmatpush.msra.mxu2 %v1460_v21 }
0x1097   :  { %v1514_v60 = vpop.f32.mrf.mxu2 }
0x109f   :  { %v704_v0 = vpop.f32.mrf.mxu2 }
0x10a0   :  { %v707_v1 = vadd.f32 %v704_v0, %v609_v63 }
0x10a2   :  { %v708_v2 = vmul.f32 %v707_v1, %v1324_v14 }
0x10a4   :  { %1147 = vtanh.f32 %v708_v2 }
0x10aa   :  { %v1148_v3 = vpop.eup %1147 }
0x10ab   :  { %v710_v4 = vmul.f32 0.5, %v1148_v3 }
0x10ad   :  { %v711_v5 = vadd.f32 0.5, %v710_v4 }
0x10af   :  { %v712_v7 = vsel %vm1318_vm4, %v1148_v3, %v711_v5 }
0x10b0   :  { %715 = vrot.lane.b32.xlu2 %v712_v7, %s1207_s2  ;;  %v713_v11 = vmul.f32 %v712_v7, %v674_v51 }
0x110a   :  { %v716_v8 = vpop.permute.xlu2 %715 }
0x110b   :  { %v718_v10 = vmul.f32 %v716_v8, %v712_v7 }
0x110d   :  { %720 = vrot.lane.b32.xlu0 %v718_v10, %s1208_s21 }
0x117f   :  { %v721_v13 = vpop.permute.xlu0 %720 }
0x1180   :  { %v723_v15 = vadd.f32 %v721_v13, %v713_v11 }
0x1182   :  { %1149 = vtanh.f32 %v723_v15 }
0x1188   :  { %v1150_v16 = vpop.eup %1149 }
0x1189   :  { %726 = vrot.lane.b32.xlu1 %v1150_v16, %s1207_s2 }
0x11fb   :  { %v727_v17 = vpop.permute.xlu1 %726 }
0x11fc   :  { %v729_v22 = vmul.f32 %v727_v17, %v712_v7  ;;  %v620_v17 = vpop.f32.mrf.mxu3 }
0x11fe   :  { %732 = vrot.lane.b32.xlu2 %v729_v22, %s1208_s21  ;;  %v621_v22 = vadd.f32 %v1482_v27, %v620_v17 }
0x1258   :  { %v733_v23 = vpop.permute.xlu2 %732 }
0x1259   :  { %1100 = vmatmul.msk.f32.vlgmr.msra.gmra.mxu1 %vm139_vm5, %v733_v23 }
0x125a   :  { %944 = vmatpush.msra.mxu1 %v1441_v18 }
0x125c   :  { %945 = vmatpush.msra.mxu1 %v1446_v19 }
0x125e   :  { %946 = vmatpush.msra.mxu1 %v1453_v20 }
0x1260   :  { %947 = vmatpush.msra.mxu1 %v1460_v21 }
0x12d6   :  { %v753_v26 = vpop.f32.mrf.mxu1 }
0x12d7   :  { %v756_v28 = vadd.f32 %v753_v26, %v612_v25 }
0x12d9   :  { %v757_v6 = vmul.f32 %v756_v28, %v1324_v14 }
0x12db   :  { %1151 = vtanh.f32 %v757_v6 }
0x12e1   :  { %v1152_v29 = vpop.eup %1151 }
0x12e2   :  { %v759_v30 = vmul.f32 0.5, %v1152_v29 }
0x12e4   :  { %v760_v31 = vadd.f32 0.5, %v759_v30  ;;  %v128_v30 = vadd.f32 %v1315_v9, %v1428_v61 }
0x12e6   :  { %v761_v32 = vsel %vm1318_vm4, %v1152_v29, %v760_v31  ;;  %v520_v31 = vadd.f32 %v1514_v60, %v128_v30 }
0x12e7   :  { %764 = vrot.lane.b32.xlu0 %v761_v32, %s1207_s2  ;;  %v762_v35 = vmul.f32 %v761_v32, %v723_v15 }
0x1359   :  { %v765_v33 = vpop.permute.xlu0 %764 }
0x135a   :  { %v767_v34 = vmul.f32 %v765_v33, %v761_v32 }
0x135c   :  { %769 = vrot.lane.b32.xlu1 %v767_v34, %s1208_s21 }
0x13ce   :  { %v770_v36 = vpop.permute.xlu1 %769 }
0x13cf   :  { %v772_v37 = vadd.f32 %v770_v36, %v762_v35 }
0x13d1   :  { %1153 = vtanh.f32 %v772_v37 }
0x13d7   :  { %v1154_v38 = vpop.eup %1153 }
0x13d8   :  { %775 = vrot.lane.b32.xlu2 %v1154_v38, %s1207_s2 }
0x1432   :  { %v776_v39 = vpop.permute.xlu2 %775 }
0x1433   :  { %v778_v40 = vmul.f32 %v776_v39, %v761_v32  ;;  %v521_v32 = vmul.f32 %v520_v31, %v1324_v14 }
0x1435   :  { %781 = vrot.lane.b32.xlu0 %v778_v40, %s1208_s21 }
0x14a7   :  { %v782_v41 = vpop.permute.xlu0 %781 }
0x14a8   :  { %1101 = vmatmul.msk.f32.vlgmr.msrb.gmra.mxu2 %vm139_vm5, %v782_v41 }
0x14a9   :  { %993 = vmatpush.msrb.mxu2 %v1441_v18 }
0x14ab   :  { %994 = vmatpush.msrb.mxu2 %v1446_v19 }
0x14ad   :  { %995 = vmatpush.msrb.mxu2 %v1453_v20 }
0x14af   :  { %996 = vmatpush.msrb.mxu2 %v1460_v21 }
0x152b   :  { %v802_v44 = vpop.f32.mrf.mxu2 }
0x152c   :  { %v805_v45 = vadd.f32 %v802_v44, %v615_v43 }
0x152e   :  { %v806_v46 = vmul.f32 %v805_v45, %v1324_v14  ;;  %v623_v45 = vpop.f32.mrf.mxu3 }
0x1530   :  { %1155 = vtanh.f32 %v806_v46  ;;  %v624_v46 = vadd.f32 %v1482_v27, %v623_v45 }
0x1536   :  { %v1156_v48 = vpop.eup %1155 }
0x1537   :  { %v808_v49 = vmul.f32 0.5, %v1156_v48 }
0x1539   :  { %v809_v50 = vadd.f32 0.5, %v808_v49 }
0x153b   :  { %v810_v18 = vsel %vm1318_vm4, %v1156_v48, %v809_v50 }
0x153c   :  { %813 = vrot.lane.b32.xlu1 %v810_v18, %s1207_s2  ;;  %v811_v21 = vmul.f32 %v810_v18, %v772_v37 }
0x15ae   :  { %v814_v19 = vpop.permute.xlu1 %813 }
0x15af   :  { %v816_v20 = vmul.f32 %v814_v19, %v810_v18 }
0x15b1   :  { %818 = vrot.lane.b32.xlu2 %v816_v20, %s1208_s21 }
0x160b   :  { %v819_v51 = vpop.permute.xlu2 %818 }
0x160c   :  { %v821_v52 = vadd.f32 %v819_v51, %v811_v21 }
0x160e   :  { %1157 = vtanh.f32 %v821_v52 }
0x1614   :  { %v1158_v53 = vpop.eup %1157 }
0x1615   :  { %824 = vrot.lane.b32.xlu0 %v1158_v53, %s1207_s2 }
0x1687   :  { %v825_v54 = vpop.permute.xlu0 %824 }
0x1688   :  { %v827_v55 = vmul.f32 %v825_v54, %v810_v18 }
0x168a   :  { %830 = vrot.lane.b32.xlu1 %v827_v55, %s1208_s21 }
0x16fc   :  { %v831_v56 = vpop.permute.xlu1 %830 }
0x16fd   :  { %1102 = vmatmul.msk.f32.vlgmr.msrb.gmra.mxu1 %vm139_vm5, %v831_v56 }
0x177a   :  { %v851_v59 = vpop.f32.mrf.mxu1 }
0x177b   :  { %v854_v62 = vadd.f32 %v851_v59, %v618_v58 }
0x177d   :  { %v855_v63 = vmul.f32 %v854_v62, %v1324_v14 }
0x177f   :  { %1159 = vtanh.f32 %v855_v63 }
0x1785   :  { %v1160_v0 = vpop.eup %1159 }
0x1786   :  { %v857_v1 = vmul.f32 0.5, %v1160_v0 }
0x1788   :  { %v858_v2 = vadd.f32 0.5, %v857_v1 }
0x178a   :  { %v859_v3 = vsel %vm1318_vm4, %v1160_v0, %v858_v2 }
0x178b   :  { %862 = vrot.lane.b32.xlu2 %v859_v3, %s1207_s2  ;;  %v860_v7 = vmul.f32 %v859_v3, %v821_v52 }
0x17e5   :  { %v863_v4 = vpop.permute.xlu2 %862 }
0x17e6   :  { %v865_v5 = vmul.f32 %v863_v4, %v859_v3 }
0x17e8   :  { %867 = vrot.lane.b32.xlu0 %v865_v5, %s1208_s21 }
0x185a   :  { %v868_v8 = vpop.permute.xlu0 %867 }
0x185b   :  { %v870_v10 = vadd.f32 %v868_v8, %v860_v7 }
0x185d   :  { %1161 = vtanh.f32 %v870_v10 }
0x1863   :  { %v1162_v11 = vpop.eup %1161 }
0x1864   :  { %873 = vrot.lane.b32.xlu1 %v1162_v11, %s1207_s2 }
0x18d6   :  { %v874_v13 = vpop.permute.xlu1 %873 }
0x18d7   :  { %v876_v15 = vmul.f32 %v874_v13, %v859_v3 }
0x18d9   :  { %879 = vrot.lane.b32.xlu2 %v876_v15, %s1208_s21 }
0x1933   :  { %v880_v16 = vpop.permute.xlu2 %879 }
0x1934   :  { %1103 = vmatmul.msk.f32.vlgmr.msra.gmra.mxu2 %vm139_vm5, %v880_v16 }
0x19b7   :  { %v900_v23 = vpop.f32.mrf.mxu2 }
0x19b8   :  { %v903_v24 = vadd.f32 %v900_v23, %v621_v22 }
0x19ba   :  { %v904_v25 = vmul.f32 %v903_v24, %v1324_v14 }
0x19bc   :  { %1163 = vtanh.f32 %v904_v25 }
0x19bd   :  { %1165 = vtanh.f32 %v521_v32  ;;  %v1114_v32 = vld [vmem:[%s1626_s8] ss:$0 sm:$0xff] }
0x19c2   :  { %v1164_v26 = vpop.eup %1163 }
0x19c3   :  { %v906_v28 = vmul.f32 0.5, %v1164_v26  ;;  %v1166_v33 = vpop.eup %1165 }
0x19c4   :  { %v523_v36 = vmul.f32 0.5, %v1166_v33 }
0x19c5   :  { %v907_v6 = vadd.f32 0.5, %v906_v28  ;;  %v1025_v28 = vld [vmem:[%s1625_s7 + $0x8] sm:$0xff] }
0x19c6   :  { %v524_v37 = vadd.f32 0.5, %v523_v36 }
0x19c7   :  { %v908_v29 = vsel %vm1318_vm4, %v1164_v26, %v907_v6  ;;  %v1024_v6 = vld [vmem:[%s1625_s7] sm:$0xff] }
0x19c8   :  { %911 = vrot.lane.b32.xlu0 %v908_v29, %s1207_s2  ;;  %v525_v38 = vsel %vm1318_vm4, %v1166_v33, %v524_v37  ;;  %v909_v39 = vmul.f32 %v908_v29, %v870_v10 }
0x19c9   :  { %v526_v20 = vmul.f32 %v525_v38, %v1495_v47 }
0x1a3a   :  { %v912_v34 = vpop.permute.xlu0 %911 }
0x1a3b   :  { %v914_v35 = vmul.f32 %v912_v34, %v908_v29 }
0x1a3d   :  { %916 = vrot.lane.b32.xlu1 %v914_v35, %s1208_s21 }
0x1a45   :  { %528 = vrot.lane.b32.xlu1 %v525_v38, %s1207_s2 }
0x1aaf   :  { %v917_v40 = vpop.permute.xlu1 %916 }
0x1ab0   :  { %v919_v9 = vadd.f32 %v917_v40, %v909_v39 }
0x1ab2   :  { %1167 = vtanh.f32 %v919_v9 }
0x1ab7   :  { %v529_v42 = vpop.permute.xlu1 %528 }
0x1ab8   :  { %v1168_v61 = vpop.eup %1167  ;;  %v531_v43 = vmul.f32 %v529_v42, %v525_v38 }
0x1ab9   :  { %922 = vrot.lane.b32.xlu2 %v1168_v61, %s1207_s2 }
0x1b13   :  { %v923_v60 = vpop.permute.xlu2 %922 }
0x1b14   :  { %v925_v41 = vmul.f32 %v923_v60, %v908_v29 }
0x1b16   :  { %928 = vrot.lane.b32.xlu0 %v925_v41, %s1208_s21 }
0x1b1e   :  { %533 = vrot.lane.b32.xlu0 %v531_v43, %s1208_s21 }
0x1b88   :  { %v929_v44 = vpop.permute.xlu0 %928 }
0x1b89   :  { %1104 = vmatmul.msk.f32.vlgmr.msra.gmra.mxu1 %vm139_vm5, %v929_v44 }
0x1b90   :  { %v534_v19 = vpop.permute.xlu0 %533 }
0x1b91   :  { %v536_v51 = vadd.f32 %v534_v19, %v526_v20 }
0x1c06   :  { %v949_v48 = vpop.f32.mrf.mxu1 }
0x1c07   :  { %v952_v49 = vadd.f32 %v949_v48, %v624_v46 }
0x1c09   :  { %v953_v50 = vmul.f32 %v952_v49, %v1324_v14 }
0x1c0b   :  { %1169 = vtanh.f32 %v953_v50 }
0x1c0c   :  { %1171 = vtanh.f32 %v536_v51 }
0x1c11   :  { %v1170_v18 = vpop.eup %1169 }
0x1c12   :  { %v955_v21 = vmul.f32 0.5, %v1170_v18  ;;  %v1172_v54 = vpop.eup %1171 }
0x1c14   :  { %v956_v52 = vadd.f32 0.5, %v955_v21 }
0x1c16   :  { %v957_v53 = vsel %vm1318_vm4, %v1170_v18, %v956_v52 }
0x1c17   :  { %960 = vrot.lane.b32.xlu2 %v957_v53, %s1207_s2  ;;  %v958_v47 = vmul.f32 %v957_v53, %v919_v9 }
0x1c1f   :  { %539 = vrot.lane.b32.xlu2 %v1172_v54, %s1207_s2 }
0x1c71   :  { %v961_v55 = vpop.permute.xlu2 %960 }
0x1c72   :  { %v963_v56 = vmul.f32 %v961_v55, %v957_v53 }
0x1c74   :  { %965 = vrot.lane.b32.xlu1 %v963_v56, %s1208_s21 }
0x1c79   :  { %v540_v57 = vpop.permute.xlu2 %539 }
0x1c7a   :  { %v542_v58 = vmul.f32 %v540_v57, %v525_v38 }
0x1c7c   :  { %544 = vrot.lane.b32.xlu1 %v542_v58, %s1208_s21 }
0x1ce6   :  { %v966_v59 = vpop.permute.xlu1 %965 }
0x1ce7   :  { %v968_v62 = vadd.f32 %v966_v59, %v958_v47 }
0x1ce9   :  { %1173 = vtanh.f32 %v968_v62 }
0x1cee   :  { %v545_v63 = vpop.permute.xlu1 %544 }
0x1cef   :  { %v1174_v0 = vpop.eup %1173  ;;  %547 = vst.msk [vmem:[#allocation4 + $0x38] sm:$0xff] %vm139_vm5, %v545_v63 }
0x1cf0   :  { %971 = vrot.lane.b32.xlu0 %v1174_v0, %s1207_s2 }
0x1cf6   :  { %v555_v1 = vld [vmem:[#allocation4 + $0x38] sm:$0xff] }
0x1cf7   :  { %1098 = vmatmul.msk.f32.gmra.mxu3 %vm139_vm5, %v555_v1 }
0x1d62   :  { %v972_v2 = vpop.permute.xlu0 %971 }
0x1d63   :  { %v974_v3 = vmul.f32 %v972_v2, %v957_v53 }
0x1d65   :  { %977 = vrot.lane.b32.xlu2 %v974_v3, %s1208_s21 }
0x1d7a   :  { %v626_v5 = vpop.f32.mrf.mxu3 }
0x1d7b   :  { %v627_v7 = vadd.f32 %v1482_v27, %v626_v5 }
0x1dbf   :  { %v978_v4 = vpop.permute.xlu2 %977 }
0x1dc0   :  { %1105 = vmatmul.msk.f32.vlgmr.msrb.gmra.mxu2 %vm139_vm5, %v978_v4 }
0x1e43   :  { %v998_v8 = vpop.f32.mrf.mxu2 }
0x1e44   :  { %v1001_v10 = vadd.f32 %v998_v8, %v627_v7 }
0x1e46   :  { %v1002_v11 = vmul.f32 %v1001_v10, %v1324_v14  ;;  %v1027_v14 = vld [vmem:[%s1625_s7 + $0x18] sm:$0xff] }
0x1e47   :  { %1049 = vmatpush.msrb.mxu1 %v1027_v14 }
0x1e48   :  { %1175 = vtanh.f32 %v1002_v11 }
0x1e49   :  { %1050 = vmatpush.msrb.mxu1 %v1026_v12 }
0x1e4b   :  { %1051 = vmatpush.msrb.mxu1 %v1025_v28 }
0x1e4d   :  { %1052 = vmatpush.msrb.mxu1 %v1024_v6 }
0x1e4e   :  { %v1176_v13 = vpop.eup %1175 }
0x1e4f   :  { %v1004_v15 = vmul.f32 0.5, %v1176_v13 }
0x1e51   :  { %v1005_v16 = vadd.f32 0.5, %v1004_v15 }
0x1e53   :  { %v1006_v17 = vsel %vm1318_vm4, %v1176_v13, %v1005_v16 }
0x1e54   :  { %1009 = vrot.lane.b32.xlu0 %v1006_v17, %s1207_s2  ;;  %v1007_v24 = vmul.f32 %v1006_v17, %v968_v62 }
0x1ec6   :  { %v1010_v22 = vpop.permute.xlu0 %1009 }
0x1ec7   :  { %v1012_v23 = vmul.f32 %v1010_v22, %v1006_v17 }
0x1ec9   :  { %1014 = vrot.lane.b32.xlu1 %v1012_v23, %s1208_s21 }
0x1f3b   :  { %v1015_v25 = vpop.permute.xlu1 %1014 }
0x1f3c   :  { %v1017_v27 = vadd.f32 %v1015_v25, %v1007_v24 }
0x1f3e   :  { %1177 = vtanh.f32 %v1017_v27 }
0x1f44   :  { %v1178_v26 = vpop.eup %1177 }
0x1f45   :  { %1020 = vrot.lane.b32.xlu2 %v1178_v26, %s1207_s2 }
0x1f9f   :  { %v1021_v29 = vpop.permute.xlu2 %1020 }
0x1fa0   :  { %v1023_v30 = vmul.f32 %v1021_v29, %v1006_v17 }
0x1fa2   :  { %1033 = vrot.lane.b32.xlu0 %v1023_v30, %s1208_s21 }
0x2014   :  { %v1034_v31 = vpop.permute.xlu0 %1033 }
0x2015   :  { %1106 = vmatmul.msk.f32.vlgmr.msrb.gmra.mxu1 %vm139_vm5, %v1034_v31 }
0x2092   :  { %v1054_v33 = vpop.f32.mrf.mxu1 }
0x2093   :  { %v1055_v34 = vadd.f32 %v1114_v32, %v1054_v33 }
0x2095   :  { %1058 = vst.msk [vmem:[#allocation5] sm:$0xff] %vm1057_vm6, %v1055_v34 }
0x2096   :  { %1069 = dma.vmem_to_hbm [thread:$0]  %s1065_s16, 128, %s1067_s1, [#allocation6]  }
0x2097   :  { %1203 = dma.done.wait [#allocation6], 128  }
0x2098   :  { %1204 = vsyncadd [#allocation6], 4294967168 }
0x2099   :  { %1074 = vsyncpa [#allocation6], 1 }

</bundles_post_ra>
